<compile_context>
chip_gen: v7x
topology: tpu7x:2x2x1
jax: 0.10.0
libtpu: 0.0.40
codegen_flags: <defaults>
</compile_context>

<pallas_src>
import functools

import jax
import jax.numpy as jnp
from jax.experimental import pallas as pl
from jax.experimental.pallas import tpu as pltpu


# ----------------------------------------------------------------------------
# Kernel 1: [optional fused BN+LeakyReLU on the input] -> 3x3 conv (stride 1,
# padding 1 via an in-kernel VMEM halo) + bias, emitting per-batch partial
# channel sums / sums-of-squares for the following BatchNorm.
# ----------------------------------------------------------------------------
def conv3x3_kernel(x_ref, w_ref, b_ref, scale_ref, shift_ref,
                   y_ref, psum_ref, pssq_ref, xpad_ref, *, apply_act):
    # x_ref     : (1, H, W, Cin)        input tile for one batch element
    # w_ref     : (9*Cin, Cout)         im2col-flattened 3x3 weights
    # b_ref     : (1, Cout)             conv bias
    # scale_ref : (1, Cin)              folded-BN scale of the previous layer
    # shift_ref : (1, Cin)              folded-BN shift of the previous layer
    # y_ref     : (1, H, W, Cout)       pre-BN conv output
    # psum_ref  : (1, 1, Cout)          per-batch partial sum (BN stats)
    # pssq_ref  : (1, 1, Cout)          per-batch partial sum of squares
    # xpad_ref  : (H+2, W+2, Cin) VMEM  halo buffer (replaces wrapper jnp.pad)
    _, H, W, Cin = x_ref.shape
    Cout = w_ref.shape[1]

    x = x_ref[0]                                   # (H, W, Cin)
    if apply_act:                                  # fused BN + LeakyReLU of prev layer
        z = x * scale_ref[0] + shift_ref[0]
        x = jnp.where(z >= 0, z, 0.01 * z)

    # Build the zero halo in VMEM (border stays zero; interior overwritten
    # every iteration so it is safe under "parallel" grid semantics).
    xpad_ref[...] = jnp.zeros(xpad_ref.shape, xpad_ref.dtype)
    xpad_ref[1:H + 1, 1:W + 1, :] = x

    # im2col: one (H*W, 9*Cin) x (9*Cin, Cout) MXU contraction instead of nine
    # skinny K=Cin matmuls.
    taps = [xpad_ref[kh:kh + H, kw:kw + W, :]      # (H, W, Cin) each
            for kh in range(3) for kw in range(3)]
    patch = jnp.concatenate(taps, axis=-1).reshape(H * W, 9 * Cin)
    acc = jnp.dot(patch, w_ref[...], preferred_element_type=jnp.float32)
    acc = acc + b_ref[...]                         # (1, Cout) broadcast

    y_ref[...] = acc.reshape(1, H, W, Cout)

    # Per-batch partial BN statistics; reduced over the batch in JAX glue so
    # the batch grid axis can stay "parallel" (v7x megacore friendly).
    psum_ref[...] = jnp.sum(acc, axis=0)[None, None, :]
    pssq_ref[...] = jnp.sum(acc * acc, axis=0)[None, None, :]


def conv3x3(x_nhwc, w, b, scale, shift, *, apply_act):
    N, H, W, Cin = x_nhwc.shape
    Cout = w.shape[-1]
    w2d = w.reshape(9 * Cin, Cout)    # (kh, kw, cin) row order matches im2col
    kernel = functools.partial(conv3x3_kernel, apply_act=apply_act)
    y, psum, pssq = pl.pallas_call(
        kernel,
        out_shape=(
            jax.ShapeDtypeStruct((N, H, W, Cout), jnp.float32),
            jax.ShapeDtypeStruct((N, 1, Cout), jnp.float32),
            jax.ShapeDtypeStruct((N, 1, Cout), jnp.float32),
        ),
        grid_spec=pltpu.PrefetchScalarGridSpec(
            num_scalar_prefetch=0,
            grid=(N,),
            in_specs=[
                pl.BlockSpec((1, H, W, Cin), lambda n: (n, 0, 0, 0)),
                pl.BlockSpec((9 * Cin, Cout), lambda n: (0, 0)),
                pl.BlockSpec((1, Cout), lambda n: (0, 0)),
                pl.BlockSpec((1, Cin), lambda n: (0, 0)),
                pl.BlockSpec((1, Cin), lambda n: (0, 0)),
            ],
            out_specs=[
                pl.BlockSpec((1, H, W, Cout), lambda n: (n, 0, 0, 0)),
                pl.BlockSpec((1, 1, Cout), lambda n: (n, 0, 0)),
                pl.BlockSpec((1, 1, Cout), lambda n: (n, 0, 0)),
            ],
            scratch_shapes=[pltpu.VMEM((H + 2, W + 2, Cin), jnp.float32)],
        ),
        compiler_params=pltpu.CompilerParams(
            dimension_semantics=("parallel",)),   # no cross-batch accumulator
    )(x_nhwc, w2d, b.reshape(1, Cout), scale, shift)
    return y, psum, pssq


# ----------------------------------------------------------------------------
# Kernel 2: final fused per-channel affine (folded BatchNorm) + LeakyReLU on a
# lane-dense 2-D (rows, W*C) view.
# ----------------------------------------------------------------------------
def bn_lrelu_kernel(y_ref, scale_ref, shift_ref, o_ref):
    z = y_ref[...] * scale_ref[...] + shift_ref[...]   # (rows, L) * (1, L)
    o_ref[...] = jnp.where(z >= 0, z, 0.01 * z)


def bn_lrelu(y2d, scale_wide, shift_wide):
    R, L = y2d.shape
    rb = R if R <= 512 else 512                        # big row strips when large
    return pl.pallas_call(
        bn_lrelu_kernel,
        out_shape=jax.ShapeDtypeStruct((R, L), jnp.float32),
        grid_spec=pltpu.PrefetchScalarGridSpec(
            num_scalar_prefetch=0,
            grid=(pl.cdiv(R, rb),),
            in_specs=[
                pl.BlockSpec((rb, L), lambda i: (i, 0)),
                pl.BlockSpec((1, L), lambda i: (0, 0)),
                pl.BlockSpec((1, L), lambda i: (0, 0)),
            ],
            out_specs=pl.BlockSpec((rb, L), lambda i: (i, 0)),
        ),
        compiler_params=pltpu.CompilerParams(
            dimension_semantics=("parallel",)),
    )(y2d, scale_wide, shift_wide)


# ----------------------------------------------------------------------------
# BN glue: fold the batch statistics into a per-channel scale/shift.
# ----------------------------------------------------------------------------
def _bn_scale_shift(psum, pssq, gamma, beta, count, eps):
    s = jnp.sum(psum[:, 0, :], axis=0)                 # (C,)
    sq = jnp.sum(pssq[:, 0, :], axis=0)                # (C,)
    mean = s / count
    var = jnp.maximum(sq / count - mean * mean, 0.0)   # biased batch variance
    scale = gamma[0] / jnp.sqrt(var + eps)
    shift = beta[0] - mean * scale
    return scale, shift                                # (C,), (C,)


# ----------------------------------------------------------------------------
# conv_block forward (NCHW in / NCHW out, like the PyTorch module)
# ----------------------------------------------------------------------------
def conv_block_forward(x_nchw, params, eps=1e-5):
    N, Cin, H, W = x_nchw.shape
    x = jnp.transpose(x_nchw, (0, 2, 3, 1)).astype(jnp.float32)  # NCHW -> NHWC

    # ---- layer 1: conv only (raw input, no fused activation) ---------------
    w1 = params["w1"]
    C1 = w1.shape[-1]
    dummy_scale = jnp.ones((1, Cin), jnp.float32)
    dummy_shift = jnp.zeros((1, Cin), jnp.float32)
    y1, ps1, pq1 = conv3x3(x, w1, params["b1"], dummy_scale, dummy_shift,
                           apply_act=False)
    scale1, shift1 = _bn_scale_shift(ps1, pq1, params["gamma1"],
                                     params["beta1"], N * H * W, eps)

    # ---- layer 2: BN1 + LeakyReLU fused into the conv input path -----------
    w2 = params["w2"]
    C2 = w2.shape[-1]
    y2, ps2, pq2 = conv3x3(y1, w2, params["b2"],
                           scale1.reshape(1, C1), shift1.reshape(1, C1),
                           apply_act=True)
    scale2, shift2 = _bn_scale_shift(ps2, pq2, params["gamma2"],
                                     params["beta2"], N * H * W, eps)

    # ---- final BN2 + LeakyReLU, lane-dense (N*H, W*C2) view -----------------
    sw2 = jnp.tile(scale2, W).reshape(1, W * C2)       # index w*C2+c -> scale2[c]
    sh2 = jnp.tile(shift2, W).reshape(1, W * C2)
    out2d = bn_lrelu(y2.reshape(N * H, W * C2), sw2, sh2)
    out = out2d.reshape(N, H, W, C2)
    return jnp.transpose(out, (0, 3, 1, 2))            # NHWC -> NCHW


# ----------------------------------------------------------------------------
# Deterministic parameter init (shapes from conv_block.__init__)
# ----------------------------------------------------------------------------
def init_params(key, in_ch, out_ch):
    ks = jax.random.split(key, 8)

    def conv_w(k, cin, cout):
        std = 1.0 / jnp.sqrt(cin * 9.0)
        return jax.random.normal(k, (3, 3, cin, cout), jnp.float32) * std

    return {
        "w1": conv_w(ks[0], in_ch, out_ch),
        "b1": jax.random.normal(ks[1], (out_ch,), jnp.float32) * 0.05,
        "gamma1": 1.0 + 0.1 * jax.random.normal(ks[2], (1, out_ch), jnp.float32),
        "beta1": 0.1 * jax.random.normal(ks[3], (1, out_ch), jnp.float32),
        "w2": conv_w(ks[4], out_ch, out_ch),
        "b2": jax.random.normal(ks[5], (out_ch,), jnp.float32) * 0.05,
        "gamma2": 1.0 + 0.1 * jax.random.normal(ks[6], (1, out_ch), jnp.float32),
        "beta2": 0.1 * jax.random.normal(ks[7], (1, out_ch), jnp.float32),
    }


# ----------------------------------------------------------------------------
# Pure-JAX reference (for correctness check only)
# ----------------------------------------------------------------------------
def reference_forward(x_nchw, params, eps=1e-5):
    x = x_nchw.astype(jnp.float32)
    for i in (1, 2):
        w = jnp.transpose(params[f"w{i}"], (3, 2, 0, 1))  # -> OIHW
        y = jax.lax.conv_general_dilated(
            x, w, window_strides=(1, 1), padding=((1, 1), (1, 1)),
            dimension_numbers=("NCHW", "OIHW", "NCHW"))
        y = y + params[f"b{i}"][None, :, None, None]
        mean = jnp.mean(y, axis=(0, 2, 3), keepdims=True)
        var = jnp.var(y, axis=(0, 2, 3), keepdims=True)
        gamma = params[f"gamma{i}"][0][None, :, None, None]
        beta = params[f"beta{i}"][0][None, :, None, None]
        z = (y - mean) / jnp.sqrt(var + eps) * gamma + beta
        x = jnp.where(z >= 0, z, 0.01 * z)
    return x


if __name__ == "__main__":
    key = jax.random.PRNGKey(0)
    kx, kp = jax.random.split(key)

    N, in_ch, out_ch, H, W = 2, 4, 8, 16, 16
    x = jax.random.normal(kx, (N, in_ch, H, W), jnp.float32)
    params = init_params(kp, in_ch, out_ch)

    out = conv_block_forward(x, params)
    out = jax.block_until_ready(out)

    ref = jax.block_until_ready(reference_forward(x, params))
    assert out.shape == (N, out_ch, H, W), out.shape
    assert jnp.allclose(out, ref, rtol=1e-4, atol=1e-4), (
        float(jnp.max(jnp.abs(out - ref))))

    print("KERNEL_OK")
</pallas_src>

<mosaic_0001>
module attributes {stable_mosaic.version = 11 : i64} {
  func.func @conv3x3_kernel(%arg0: i32, %arg1: memref<1x16x16x4xf32, #tpu.memory_space<vmem>>, %arg2: memref<36x8xf32, #tpu.memory_space<vmem>>, %arg3: memref<1x8xf32, #tpu.memory_space<vmem>>, %arg4: memref<1x4xf32, #tpu.memory_space<vmem>>, %arg5: memref<1x4xf32, #tpu.memory_space<vmem>>, %arg6: memref<1x16x16x8xf32, #tpu.memory_space<vmem>>, %arg7: memref<1x1x8xf32, #tpu.memory_space<vmem>>, %arg8: memref<1x1x8xf32, #tpu.memory_space<vmem>>, %arg9: memref<18x18x4xf32, #tpu.memory_space<vmem>>) attributes {dimension_semantics = [#tpu.dimension_semantics<parallel>], iteration_bounds = array<i64: 2>, scalar_prefetch = 0 : i64, scratch_operands = 1 : i64, tpu.core_type = #tpu.core_type<tc>, window_params = [{transform_indices = @transform_0, window_bounds = array<i64: 1, 16, 16, 4>}, {pipeline_mode = #tpu.pipeline_mode<synchronous>, transform_indices = @transform_1, window_bounds = array<i64: 36, 8>}, {pipeline_mode = #tpu.pipeline_mode<synchronous>, transform_indices = @transform_2, window_bounds = array<i64: 1, 8>}, {pipeline_mode = #tpu.pipeline_mode<synchronous>, transform_indices = @transform_3, window_bounds = array<i64: 1, 4>}, {pipeline_mode = #tpu.pipeline_mode<synchronous>, transform_indices = @transform_4, window_bounds = array<i64: 1, 4>}, {transform_indices = @transform_5, window_bounds = array<i64: 1, 16, 16, 8>}, {transform_indices = @transform_6, window_bounds = array<i64: 1, 1, 8>}, {transform_indices = @transform_7, window_bounds = array<i64: 1, 1, 8>}]} {
    %c0 = arith.constant 0 : index
    %c0_0 = arith.constant 0 : index
    %c0_1 = arith.constant 0 : index
    %c0_2 = arith.constant 0 : index
    %0 = vector.load %arg1[%c0, %c0_0, %c0_1, %c0_2] : memref<1x16x16x4xf32, #tpu.memory_space<vmem>>, vector<1x16x16x4xf32>
    %1 = vector.shape_cast %0 : vector<1x16x16x4xf32> to vector<16x16x4xf32>
    %cst = arith.constant 0.000000e+00 : f32
    %2 = vector.broadcast %cst : f32 to vector<18x18x4xf32>
    %c0_3 = arith.constant 0 : index
    %c0_4 = arith.constant 0 : index
    %c0_5 = arith.constant 0 : index
    %3 = vector.load %arg9[%c0_3, %c0_4, %c0_5] : memref<18x18x4xf32, #tpu.memory_space<vmem>>, vector<18x18x4xf32>
    tpu.vector_store %arg9[%c0_3, %c0_4, %c0_5], %2 {strides = array<i32>} : memref<18x18x4xf32, #tpu.memory_space<vmem>>, vector<18x18x4xf32>,
    %c1 = arith.constant 1 : index
    %c1_6 = arith.constant 1 : index
    %c0_7 = arith.constant 0 : index
    %4 = vector.load %arg9[%c1, %c1_6, %c0_7] : memref<18x18x4xf32, #tpu.memory_space<vmem>>, vector<16x16x4xf32>
    tpu.vector_store %arg9[%c1, %c1_6, %c0_7], %1 {strides = array<i32>} : memref<18x18x4xf32, #tpu.memory_space<vmem>>, vector<16x16x4xf32>,
    %c0_8 = arith.constant 0 : index
    %c0_9 = arith.constant 0 : index
    %c0_10 = arith.constant 0 : index
    %5 = vector.load %arg9[%c0_8, %c0_9, %c0_10] : memref<18x18x4xf32, #tpu.memory_space<vmem>>, vector<16x16x4xf32>
    %c0_11 = arith.constant 0 : index
    %c1_12 = arith.constant 1 : index
    %c0_13 = arith.constant 0 : index
    %6 = vector.load %arg9[%c0_11, %c1_12, %c0_13] : memref<18x18x4xf32, #tpu.memory_space<vmem>>, vector<16x16x4xf32>
    %c0_14 = arith.constant 0 : index
    %c2 = arith.constant 2 : index
    %c0_15 = arith.constant 0 : index
    %7 = vector.load %arg9[%c0_14, %c2, %c0_15] : memref<18x18x4xf32, #tpu.memory_space<vmem>>, vector<16x16x4xf32>
    %c1_16 = arith.constant 1 : index
    %c0_17 = arith.constant 0 : index
    %c0_18 = arith.constant 0 : index
    %8 = vector.load %arg9[%c1_16, %c0_17, %c0_18] : memref<18x18x4xf32, #tpu.memory_space<vmem>>, vector<16x16x4xf32>
    %c1_19 = arith.constant 1 : index
    %c1_20 = arith.constant 1 : index
    %c0_21 = arith.constant 0 : index
    %9 = vector.load %arg9[%c1_19, %c1_20, %c0_21] : memref<18x18x4xf32, #tpu.memory_space<vmem>>, vector<16x16x4xf32>
    %c1_22 = arith.constant 1 : index
    %c2_23 = arith.constant 2 : index
    %c0_24 = arith.constant 0 : index
    %10 = vector.load %arg9[%c1_22, %c2_23, %c0_24] : memref<18x18x4xf32, #tpu.memory_space<vmem>>, vector<16x16x4xf32>
    %c2_25 = arith.constant 2 : index
    %c0_26 = arith.constant 0 : index
    %c0_27 = arith.constant 0 : index
    %11 = vector.load %arg9[%c2_25, %c0_26, %c0_27] : memref<18x18x4xf32, #tpu.memory_space<vmem>>, vector<16x16x4xf32>
    %c2_28 = arith.constant 2 : index
    %c1_29 = arith.constant 1 : index
    %c0_30 = arith.constant 0 : index
    %12 = vector.load %arg9[%c2_28, %c1_29, %c0_30] : memref<18x18x4xf32, #tpu.memory_space<vmem>>, vector<16x16x4xf32>
    %c2_31 = arith.constant 2 : index
    %c2_32 = arith.constant 2 : index
    %c0_33 = arith.constant 0 : index
    %13 = vector.load %arg9[%c2_31, %c2_32, %c0_33] : memref<18x18x4xf32, #tpu.memory_space<vmem>>, vector<16x16x4xf32>
    %14 = tpu.concatenate %5, %6, %7, %8, %9, %10, %11, %12, %13 in 2 : vector<16x16x4xf32>, vector<16x16x4xf32>, vector<16x16x4xf32>, vector<16x16x4xf32>, vector<16x16x4xf32>, vector<16x16x4xf32>, vector<16x16x4xf32>, vector<16x16x4xf32>, vector<16x16x4xf32> -> vector<16x16x36xf32>
    %15 = vector.shape_cast %14 : vector<16x16x36xf32> to vector<256x36xf32>
    %c0_34 = arith.constant 0 : index
    %c0_35 = arith.constant 0 : index
    %16 = vector.load %arg2[%c0_34, %c0_35] : memref<36x8xf32, #tpu.memory_space<vmem>>, vector<36x8xf32>
    %cst_36 = arith.constant dense<0.000000e+00> : vector<256x8xf32>
    %17 = tpu.matmul %15, %16, %cst_36 {dimension_numbers = #tpu.dot_dimension_numbers<[1], [0], [0], [1], [0, 0, 1, 1], [], []>} : vector<256x36xf32>, vector<36x8xf32>, vector<256x8xf32> -> vector<256x8xf32>
    %c0_37 = arith.constant 0 : index
    %c0_38 = arith.constant 0 : index
    %18 = vector.load %arg3[%c0_37, %c0_38] : memref<1x8xf32, #tpu.memory_space<vmem>>, vector<1x8xf32>
    %19 = vector.broadcast %18 : vector<1x8xf32> to vector<256x8xf32>
    %20 = arith.addf %17, %19 : vector<256x8xf32>
    %21 = vector.shape_cast %20 : vector<256x8xf32> to vector<1x16x16x8xf32>
    %c0_39 = arith.constant 0 : index
    %c0_40 = arith.constant 0 : index
    %c0_41 = arith.constant 0 : index
    %c0_42 = arith.constant 0 : index
    %22 = vector.load %arg6[%c0_39, %c0_40, %c0_41, %c0_42] : memref<1x16x16x8xf32, #tpu.memory_space<vmem>>, vector<1x16x16x8xf32>
    tpu.vector_store %arg6[%c0_39, %c0_40, %c0_41, %c0_42], %21 {strides = array<i32>} : memref<1x16x16x8xf32, #tpu.memory_space<vmem>>, vector<1x16x16x8xf32>,
    %cst_43 = arith.constant dense<0.000000e+00> : vector<8xf32>
    %23 = vector.multi_reduction <add>, %20, %cst_43 [0] : vector<256x8xf32> to vector<8xf32>
    %24 = vector.shape_cast %23 : vector<8xf32> to vector<1x1x8xf32>
    %c0_44 = arith.constant 0 : index
    %c0_45 = arith.constant 0 : index
    %c0_46 = arith.constant 0 : index
    %25 = vector.load %arg7[%c0_44, %c0_45, %c0_46] : memref<1x1x8xf32, #tpu.memory_space<vmem>>, vector<1x1x8xf32>
    tpu.vector_store %arg7[%c0_44, %c0_45, %c0_46], %24 {strides = array<i32>} : memref<1x1x8xf32, #tpu.memory_space<vmem>>, vector<1x1x8xf32>,
    %26 = arith.mulf %20, %20 : vector<256x8xf32>
    %cst_47 = arith.constant dense<0.000000e+00> : vector<8xf32>
    %27 = vector.multi_reduction <add>, %26, %cst_47 [0] : vector<256x8xf32> to vector<8xf32>
    %28 = vector.shape_cast %27 : vector<8xf32> to vector<1x1x8xf32>
    %c0_48 = arith.constant 0 : index
    %c0_49 = arith.constant 0 : index
    %c0_50 = arith.constant 0 : index
    %29 = vector.load %arg8[%c0_48, %c0_49, %c0_50] : memref<1x1x8xf32, #tpu.memory_space<vmem>>, vector<1x1x8xf32>
    tpu.vector_store %arg8[%c0_48, %c0_49, %c0_50], %28 {strides = array<i32>} : memref<1x1x8xf32, #tpu.memory_space<vmem>>, vector<1x1x8xf32>,
    return
  }
  func.func @transform_0(%arg0: i32) -> (i32, i32, i32, i32) {
    %c0_i32 = arith.constant 0 : i32
    %c0_i32_0 = arith.constant 0 : i32
    %c0_i32_1 = arith.constant 0 : i32
    %c0_i32_2 = arith.constant 0 : i32
    return %arg0, %c0_i32, %c0_i32_0, %c0_i32_1 : i32, i32, i32, i32
  }
  func.func @transform_1(%arg0: i32) -> (i32, i32) {
    %c0_i32 = arith.constant 0 : i32
    %c0_i32_0 = arith.constant 0 : i32
    %c0_i32_1 = arith.constant 0 : i32
    return %c0_i32, %c0_i32_0 : i32, i32
  }
  func.func @transform_2(%arg0: i32) -> (i32, i32) {
    %c0_i32 = arith.constant 0 : i32
    %c0_i32_0 = arith.constant 0 : i32
    %c0_i32_1 = arith.constant 0 : i32
    return %c0_i32, %c0_i32_0 : i32, i32
  }
  func.func @transform_3(%arg0: i32) -> (i32, i32) {
    %c0_i32 = arith.constant 0 : i32
    %c0_i32_0 = arith.constant 0 : i32
    %c0_i32_1 = arith.constant 0 : i32
    return %c0_i32, %c0_i32_0 : i32, i32
  }
  func.func @transform_4(%arg0: i32) -> (i32, i32) {
    %c0_i32 = arith.constant 0 : i32
    %c0_i32_0 = arith.constant 0 : i32
    %c0_i32_1 = arith.constant 0 : i32
    return %c0_i32, %c0_i32_0 : i32, i32
  }
  func.func @transform_5(%arg0: i32) -> (i32, i32, i32, i32) {
    %c0_i32 = arith.constant 0 : i32
    %c0_i32_0 = arith.constant 0 : i32
    %c0_i32_1 = arith.constant 0 : i32
    %c0_i32_2 = arith.constant 0 : i32
    return %arg0, %c0_i32, %c0_i32_0, %c0_i32_1 : i32, i32, i32, i32
  }
  func.func @transform_6(%arg0: i32) -> (i32, i32, i32) {
    %c0_i32 = arith.constant 0 : i32
    %c0_i32_0 = arith.constant 0 : i32
    %c0_i32_1 = arith.constant 0 : i32
    return %arg0, %c0_i32, %c0_i32_0 : i32, i32, i32
  }
  func.func @transform_7(%arg0: i32) -> (i32, i32, i32) {
    %c0_i32 = arith.constant 0 : i32
    %c0_i32_0 = arith.constant 0 : i32
    %c0_i32_1 = arith.constant 0 : i32
    return %arg0, %c0_i32, %c0_i32_0 : i32, i32, i32
  }
}

</mosaic_0001>

<bundles_post_ra>
// kernel: tpu_custom_call.1
= control target key start
LH: loop header
LB: loop body
LE: loop exit
PB: predicated region body
PF: predicated region fallthrough
CT: control target
= control target key end

     0   :  { %13 = vsyncpa [#allocation4], 0  ;;  %s4574_s0 = inlined_call_operand.vmem [shape: f32[2,16,16,4], index: 0, kind: input, shape index: {}]   ;;  %s4575_s1 = inlined_call_operand.vmem [shape: f32[36,8], index: 1, kind: input, shape index: {}]   ;;  %s4576_s2 = inlined_call_operand.vmem [shape: f32[1,8], index: 2, kind: input, shape index: {}]   ;;  %s4577_s3 = inlined_call_operand.vmem [shape: f32[1,4], index: 3, kind: input, shape index: {}]   ;;  %s4578_s4 = inlined_call_operand.vmem [shape: f32[1,4], index: 4, kind: input, shape index: {}]   ;;  %s4579_s5 = inlined_call_operand.vmem [shape: f32[2,16,16,8], index: 5, kind: output, shape index: {0}]   ;;  %s4580_s6 = inlined_call_operand.hbm [shape: f32[2,1,8], index: 6, kind: output, shape index: {1}]   ;;  %s4581_s7 = inlined_call_operand.hbm [shape: f32[2,1,8], index: 7, kind: output, shape index: {2}]  }
   0x1   :  { %15 = vsyncpa [#allocation4 + $0x1], 0 }
   0x2   :  { %16 = vsyncpa [#allocation6], 0 }
   0x3   :  { %18 = vsyncpa [#allocation6 + $0x1], 0  ;;  %s3041_s24 = smov 0   ;;  %s3043_s25 = smov 0  }
   0x4   :  { %s3045_s3 = smov 0   ;;  %s3047_s4 = smov 0  }
   0x5 LB: > { %s3062_s26 = sadd.s32 4294967295, %s2988_s4   ;;  %s2684_s27 = sadd.s32 4294967294, %s2988_s4   ;;  %s2988_s4 = sphi %s3047_s4, %s4683_s4   ;;  %s2984_s3 = sphi %s3045_s3, %s4682_s3   ;;  %s2980_s25 = sphi %s3043_s25, %s4681_s25   ;;  %s2976_s24 = sphi %s3041_s24, %s4680_s24  }
   0x6   : > { %s3066_s28 = sadd.s32 1, %s2988_s4   ;;  %s167_s29 = sadd.s32 1, %s2984_s3 }
   0x7   : > { %s164_s30 = ssub.s32 %s2988_s4, %s3066_s28  ;;  %p177_p0 = scmp.ne.s32.totalorder %s2984_s3, %s2980_s25 }
   0x8   : > { %p165_p1 = scmp.eq.s32.totalorder %s164_s30, 0  ;;  %p178_p2 = scmp.eq.s32.totalorder %s3062_s26, 1 }
   0x9   : > { %p183_p3 = scmp.ne.s32.totalorder %s2980_s25, %s2976_s24  ;;  %p184_p4 = scmp.eq.s32.totalorder %s2684_s27, 1 }
   0xa   : > { %s3077_s8 = scalar_select %p165_p1, %s2984_s3, %s167_s29  }
   0xb   : > { %p3079_p5 = por %p178_p2, %p177_p0  ;;  %p3083_p6 = por %p184_p4, %p183_p3 }
   0xc   : > { %p2687_p7 = scmp.ge.s32.totalorder %s2988_s4, 1  ;;  %p248_p8 = scmp.lt.s32.totalorder %s2988_s4, 3 }
   0xe   : > { %p249_p9 = pnand %p2687_p7, %p248_p8 }
  0x10   : > { %252 = sbr.rel (%p249_p9) target bundleno = 952 (0x3b8), region = 40 }
  0x17   : > { %vm330_vm0 = vcmask 31744   ;;  %vm333_vm1 = vcmask 25600   ;;  %p288_p10 = scmp.lt.s32.totalorder %s3062_s26, 1  ;;  %v2990_v0 = vmov 0.0   ;;  %s2991_s16 = smov 4   ;;  %vm2104_vm2 = vcmask 1043456  }
  0x18   : > { %331 = vst.msk [vmem:[#allocation2] sm:$0xff] %vm330_vm0, %v2990_v0  ;;  %332 = vst.msk [vmem:[#allocation2 + $0x8] sm:$0xff] %vm330_vm0, %v2990_v0  ;;  %s2992_s17 = smov 8   ;;  %s2993_s18 = smov 12   ;;  %vm1764_vm3 = vcmask 64512   ;;  %vm1797_vm4 = vcmask 97280  }
  0x19   : > { %335 = vst.msk [vmem:[#allocation2 + $0x18] sm:$0xff] %vm330_vm0, %v2990_v0  ;;  %336 = vst.msk [vmem:[#allocation2 + $0x20] sm:$0xff] %vm330_vm0, %v2990_v0  ;;  %s3147_s11 = scalar_select %p288_p10, %s3062_s26, 1  ;;  %vm1830_vm5 = vcmask 130048   ;;  %vm1863_vm6 = vcmask 162816   ;;  %vm1929_vm7 = vcmask 228352  }
  0x1a   : > { %338 = vst.msk [vmem:[#allocation2 + $0x30] sm:$0xff] %vm330_vm0, %v2990_v0  ;;  %339 = vst.msk [vmem:[#allocation2 + $0x38] sm:$0xff] %vm330_vm0, %v2990_v0  ;;  %s2994_s19 = smov 16   ;;  %s2995_s27 = smov 20   ;;  %vm1896_vm8 = vcmask 195584   ;;  %vm1962_vm9 = vcmask 261120  }
  0x1b   : > { %341 = vst.msk [vmem:[#allocation2 + $0x48] sm:$0xff] %vm330_vm0, %v2990_v0  ;;  %342 = vst.msk [vmem:[#allocation2 + $0x50] sm:$0xff] %vm330_vm0, %v2990_v0  ;;  %s2730_s12 = sshll.u32 %s3147_s11, 8  ;;  %s2997_s21 = smov 28   ;;  %vm2007_vm10 = vcmask 293888   ;;  %vm2434_vm11 = vcmask 57344  }
  0x1c   : > { %344 = vst.msk [vmem:[#allocation2 + $0x60] sm:$0xff] %vm330_vm0, %v2990_v0  ;;  %345 = vst.msk [vmem:[#allocation2 + $0x68] sm:$0xff] %vm330_vm0, %v2990_v0  ;;  %s3155_s15 = scalar_lea.vmem %s4574_s0, %s2730_s12  ;;  %s2998_s22 = smov 32  }
  0x1d   : > { %347 = vst.msk [vmem:[#allocation2 + $0x78] sm:$0xff] %vm330_vm0, %v2990_v0  ;;  %348 = vst.msk [vmem:[#allocation2 + $0x80] sm:$0xff] %vm330_vm0, %v2990_v0  ;;  %v298_v1 = vld [vmem:[%s3155_s15] sm:$0xff]  ;;  %v300_v2 = vld [vmem:[%s3155_s15 + $0x10] sm:$0xff]  ;;  %s4488_s11 = sand.u32 1, %s2980_s25  }
  0x1e   : > { %350 = vst.msk [vmem:[#allocation2 + $0x90] sm:$0xff] %vm330_vm0, %v2990_v0  ;;  %351 = vst.msk [vmem:[#allocation2 + $0x98] sm:$0xff] %vm330_vm0, %v2990_v0  ;;  %v299_v3 = vld [vmem:[%s3155_s15 + $0x8] sm:$0xff]  ;;  %v302_v4 = vld [vmem:[%s3155_s15 + $0x20] sm:$0xff]  ;;  %s281_s29 = scalar_lea.vmem [#allocation3], %s4488_s11  ;;  %s287_s13 = scalar_lea.vmem [#allocation5], %s4488_s11 }
  0x1f   : > { %353 = vst.msk [vmem:[#allocation2 + $0xa8] sm:$0xff] %vm330_vm0, %v2990_v0  ;;  %354 = vst.msk [vmem:[#allocation2 + $0xb0] sm:$0xff] %vm330_vm0, %v2990_v0  ;;  %v301_v5 = vld [vmem:[%s3155_s15 + $0x18] sm:$0xff]  ;;  %v304_v6 = vld [vmem:[%s3155_s15 + $0x30] sm:$0xff]  ;;  %s2563_s30 = sshll.u32 %s281_s29, 4  ;;  %s2576_s14 = sshll.u32 %s287_s13, 4  ;;  %s4500_s30 = int_to_ptr.vmem [resolvable:$true] %s2563_s30  ;;  %s4508_s14 = int_to_ptr.vmem [resolvable:$true] %s2576_s14 }
  0x20   : > { %356 = vst.msk [vmem:[#allocation2 + $0xc0] sm:$0xff] %vm330_vm0, %v2990_v0  ;;  %357 = vst.msk [vmem:[#allocation2 + $0xc8] sm:$0xff] %vm330_vm0, %v2990_v0  ;;  %v451_v7 = vld [vmem:[#allocation2 + $0x1] sm:$0xff]  ;;  %v305_v11 = vld [vmem:[%s3155_s15 + $0x38] sm:$0xff] }
  0x21   : > { %359 = vst.msk [vmem:[#allocation2 + $0xd8] sm:$0xff] %vm330_vm0, %v2990_v0  ;;  %360 = vst.msk [vmem:[#allocation2 + $0xe0] sm:$0xff] %vm330_vm0, %v2990_v0  ;;  %v303_v9 = vld [vmem:[%s3155_s15 + $0x28] sm:$0xff]  ;;  %740 = vrot.lane.b32.xlu0 %v451_v7, %s2991_s16  ;;  %v306_v10 = vld [vmem:[%s3155_s15 + $0x40] sm:$0xff] }
  0x22   : > { %362 = vst.msk [vmem:[#allocation2 + $0xf0] sm:$0xff] %vm330_vm0, %v2990_v0  ;;  %363 = vst.msk [vmem:[#allocation2 + $0xf8] sm:$0xff] %vm330_vm0, %v2990_v0  ;;  %v308_v12 = vld [vmem:[%s3155_s15 + $0x50] sm:$0xff]  ;;  %v307_v13 = vld [vmem:[%s3155_s15 + $0x48] sm:$0xff] }
  0x23   : > { %365 = vst.msk [vmem:[#allocation2 + $0x108] sm:$0xff] %vm330_vm0, %v2990_v0  ;;  %366 = vst.msk [vmem:[#allocation2 + $0x110] sm:$0xff] %vm330_vm0, %v2990_v0  ;;  %v310_v14 = vld [vmem:[%s3155_s15 + $0x60] sm:$0xff]  ;;  %v309_v15 = vld [vmem:[%s3155_s15 + $0x58] sm:$0xff] }
  0x24   : > { %368 = vst.msk [vmem:[#allocation2 + $0x120] sm:$0xff] %vm330_vm0, %v2990_v0  ;;  %369 = vst.msk [vmem:[#allocation2 + $0x128] sm:$0xff] %vm330_vm0, %v2990_v0  ;;  %v312_v16 = vld [vmem:[%s3155_s15 + $0x70] sm:$0xff]  ;;  %v311_v17 = vld [vmem:[%s3155_s15 + $0x68] sm:$0xff] }
  0x25   : > { %371 = vst.msk [vmem:[#allocation2 + $0x138] sm:$0xff] %vm330_vm0, %v2990_v0  ;;  %372 = vst.msk [vmem:[#allocation2 + $0x140] sm:$0xff] %vm330_vm0, %v2990_v0  ;;  %v314_v18 = vld [vmem:[%s3155_s15 + $0x80] sm:$0xff]  ;;  %v313_v19 = vld [vmem:[%s3155_s15 + $0x78] sm:$0xff] }
  0x26   : > { %374 = vst.msk [vmem:[#allocation2 + $0x150] sm:$0xff] %vm330_vm0, %v2990_v0  ;;  %375 = vst.msk [vmem:[#allocation2 + $0x158] sm:$0xff] %vm330_vm0, %v2990_v0  ;;  %v316_v20 = vld [vmem:[%s3155_s15 + $0x90] sm:$0xff]  ;;  %v315_v21 = vld [vmem:[%s3155_s15 + $0x88] sm:$0xff] }
  0x27   : > { %377 = vst.msk [vmem:[#allocation2 + $0x168] sm:$0xff] %vm330_vm0, %v2990_v0  ;;  %378 = vst.msk [vmem:[#allocation2 + $0x170] sm:$0xff] %vm330_vm0, %v2990_v0  ;;  %v318_v22 = vld [vmem:[%s3155_s15 + $0xa0] sm:$0xff]  ;;  %v317_v23 = vld [vmem:[%s3155_s15 + $0x98] sm:$0xff] }
  0x28   : > { %380 = vst.msk [vmem:[#allocation2 + $0x180] sm:$0xff] %vm330_vm0, %v2990_v0  ;;  %381 = vst.msk [vmem:[#allocation2 + $0x188] sm:$0xff] %vm330_vm0, %v2990_v0  ;;  %v320_v24 = vld [vmem:[%s3155_s15 + $0xb0] sm:$0xff]  ;;  %v319_v28 = vld [vmem:[%s3155_s15 + $0xa8] sm:$0xff] }
  0x29   : > { %383 = vst.msk [vmem:[#allocation2 + $0x198] sm:$0xff] %vm330_vm0, %v2990_v0  ;;  %384 = vst.msk [vmem:[#allocation2 + $0x1a0] sm:$0xff] %vm330_vm0, %v2990_v0  ;;  %v322_v29 = vld [vmem:[%s3155_s15 + $0xc0] sm:$0xff]  ;;  %v321_v33 = vld [vmem:[%s3155_s15 + $0xb8] sm:$0xff] }
  0x2a   : > { %334 = vst.msk [vmem:[#allocation2 + $0x10] sm:$0x3] %vm333_vm1, %v2990_v0  ;;  %337 = vst.msk [vmem:[#allocation2 + $0x28] sm:$0x3] %vm333_vm1, %v2990_v0  ;;  %v324_v34 = vld [vmem:[%s3155_s15 + $0xd0] sm:$0xff]  ;;  %v323_v35 = vld [vmem:[%s3155_s15 + $0xc8] sm:$0xff] }
  0x2b   : > { %340 = vst.msk [vmem:[#allocation2 + $0x40] sm:$0x3] %vm333_vm1, %v2990_v0  ;;  %343 = vst.msk [vmem:[#allocation2 + $0x58] sm:$0x3] %vm333_vm1, %v2990_v0  ;;  %v326_v36 = vld [vmem:[%s3155_s15 + $0xe0] sm:$0xff]  ;;  %v325_v37 = vld [vmem:[%s3155_s15 + $0xd8] sm:$0xff] }
  0x2c   : > { %346 = vst.msk [vmem:[#allocation2 + $0x70] sm:$0x3] %vm333_vm1, %v2990_v0  ;;  %349 = vst.msk [vmem:[#allocation2 + $0x88] sm:$0x3] %vm333_vm1, %v2990_v0  ;;  %v327_v39 = vld [vmem:[%s3155_s15 + $0xe8] sm:$0xff] }
  0x2d   : > { %352 = vst.msk [vmem:[#allocation2 + $0xa0] sm:$0x3] %vm333_vm1, %v2990_v0  ;;  %355 = vst.msk [vmem:[#allocation2 + $0xb8] sm:$0x3] %vm333_vm1, %v2990_v0  ;;  %v483_v62 = vld [vmem:[#allocation2 + $0x2] sm:$0xff] }
  0x2e   : > { %358 = vst.msk [vmem:[#allocation2 + $0xd0] sm:$0x3] %vm333_vm1, %v2990_v0  ;;  %361 = vst.msk [vmem:[#allocation2 + $0xe8] sm:$0x3] %vm333_vm1, %v2990_v0 }
  0x2f   : > { %364 = vst.msk [vmem:[#allocation2 + $0x100] sm:$0x3] %vm333_vm1, %v2990_v0  ;;  %367 = vst.msk [vmem:[#allocation2 + $0x118] sm:$0x3] %vm333_vm1, %v2990_v0 }
  0x30   : > { %370 = vst.msk [vmem:[#allocation2 + $0x130] sm:$0x3] %vm333_vm1, %v2990_v0  ;;  %373 = vst.msk [vmem:[#allocation2 + $0x148] sm:$0x3] %vm333_vm1, %v2990_v0 }
  0x31   : > { %376 = vst.msk [vmem:[#allocation2 + $0x160] sm:$0x3] %vm333_vm1, %v2990_v0  ;;  %379 = vst.msk [vmem:[#allocation2 + $0x178] sm:$0x3] %vm333_vm1, %v2990_v0  ;;  %v452_v8 = vld [vmem:[#allocation2 + $0x9] sm:$0xff] }
  0x32   : > { %382 = vst.msk [vmem:[#allocation2 + $0x190] sm:$0x3] %vm333_vm1, %v2990_v0  ;;  %385 = vst.msk [vmem:[#allocation2 + $0x1a8] sm:$0x3] %vm333_vm1, %v2990_v0  ;;  %742 = vrot.lane.b32.xlu0 %v452_v8, %s2991_s16 }
  0x33   : > { %387 = vst.msk [vmem:[#allocation2 + $0x19] sm:$0xff] %vm330_vm0, %v298_v1  ;;  %389 = vst.msk [vmem:[#allocation2 + $0x31] sm:$0xff] %vm330_vm0, %v300_v2  ;;  %v484_v1 = vld [vmem:[#allocation2 + $0xa] sm:$0xff] }
  0x34   : > { %388 = vst.msk [vmem:[#allocation2 + $0x21] sm:$0xff] %vm330_vm0, %v299_v3  ;;  %391 = vst.msk [vmem:[#allocation2 + $0x49] sm:$0xff] %vm330_vm0, %v302_v4 }
  0x35   : > { %390 = vst.msk [vmem:[#allocation2 + $0x39] sm:$0xff] %vm330_vm0, %v301_v5  ;;  %393 = vst.msk [vmem:[#allocation2 + $0x61] sm:$0xff] %vm330_vm0, %v304_v6 }
  0x36   : > { %392 = vst.msk [vmem:[#allocation2 + $0x51] sm:$0xff] %vm330_vm0, %v303_v9  ;;  %395 = vst.msk [vmem:[#allocation2 + $0x79] sm:$0xff] %vm330_vm0, %v306_v10 }
  0x37   : > { %394 = vst.msk [vmem:[#allocation2 + $0x69] sm:$0xff] %vm330_vm0, %v305_v11  ;;  %397 = vst.msk [vmem:[#allocation2 + $0x91] sm:$0xff] %vm330_vm0, %v308_v12 }
  0x38   : > { %396 = vst.msk [vmem:[#allocation2 + $0x81] sm:$0xff] %vm330_vm0, %v307_v13  ;;  %399 = vst.msk [vmem:[#allocation2 + $0xa9] sm:$0xff] %vm330_vm0, %v310_v14 }
  0x39   : > { %398 = vst.msk [vmem:[#allocation2 + $0x99] sm:$0xff] %vm330_vm0, %v309_v15  ;;  %401 = vst.msk [vmem:[#allocation2 + $0xc1] sm:$0xff] %vm330_vm0, %v312_v16 }
  0x3a   : > { %400 = vst.msk [vmem:[#allocation2 + $0xb1] sm:$0xff] %vm330_vm0, %v311_v17  ;;  %403 = vst.msk [vmem:[#allocation2 + $0xd9] sm:$0xff] %vm330_vm0, %v314_v18  ;;  %v3200_v25 = vld [vmem:[#allocation2 + $0x19] sm:$0xff]  ;;  %v3202_v26 = vld [vmem:[#allocation2 + $0x31] sm:$0xff] }
  0x3b   : > { %402 = vst.msk [vmem:[#allocation2 + $0xc9] sm:$0xff] %vm330_vm0, %v313_v19  ;;  %405 = vst.msk [vmem:[#allocation2 + $0xf1] sm:$0xff] %vm330_vm0, %v316_v20  ;;  %744 = vrot.lane.b32.xlu1 %v3200_v25, %s2991_s16  ;;  %v3209_v27 = vld [vmem:[#allocation2 + $0x21] sm:$0xff]  ;;  %748 = vrot.lane.b32.xlu0 %v3202_v26, %s2991_s16  ;;  %v3217_v30 = vld [vmem:[#allocation2 + $0x49] sm:$0xff] }
  0x3c   : > { %404 = vst.msk [vmem:[#allocation2 + $0xe1] sm:$0xff] %vm330_vm0, %v315_v21  ;;  %407 = vst.msk [vmem:[#allocation2 + $0x109] sm:$0xff] %vm330_vm0, %v318_v22  ;;  %v3221_v31 = vld [vmem:[#allocation2 + $0x39] sm:$0xff]  ;;  %v3225_v32 = vld [vmem:[#allocation2 + $0x61] sm:$0xff] }
  0x3d   : > { %406 = vst.msk [vmem:[#allocation2 + $0xf9] sm:$0xff] %vm330_vm0, %v317_v23  ;;  %409 = vst.msk [vmem:[#allocation2 + $0x121] sm:$0xff] %vm330_vm0, %v320_v24  ;;  %v3237_v38 = vld [vmem:[#allocation2 + $0x51] sm:$0xff]  ;;  %v3245_v40 = vld [vmem:[#allocation2 + $0x79] sm:$0xff] }
  0x3e   : > { %408 = vst.msk [vmem:[#allocation2 + $0x111] sm:$0xff] %vm330_vm0, %v319_v28  ;;  %411 = vst.msk [vmem:[#allocation2 + $0x139] sm:$0xff] %vm330_vm0, %v322_v29  ;;  %v3249_v41 = vld [vmem:[#allocation2 + $0x69] sm:$0xff]  ;;  %v3253_v42 = vld [vmem:[#allocation2 + $0x91] sm:$0xff] }
  0x3f   : > { %746 = vrot.lane.b32.xlu1 %v3209_v27, %s2991_s16  ;;  %752 = vrot.lane.b32.xlu0 %v3217_v30, %s2991_s16  ;;  %410 = vst.msk [vmem:[#allocation2 + $0x129] sm:$0xff] %vm330_vm0, %v321_v33  ;;  %413 = vst.msk [vmem:[#allocation2 + $0x151] sm:$0xff] %vm330_vm0, %v324_v34  ;;  %v3257_v43 = vld [vmem:[#allocation2 + $0x81] sm:$0xff]  ;;  %v3261_v44 = vld [vmem:[#allocation2 + $0xa9] sm:$0xff] }
  0x40   : > { %412 = vst.msk [vmem:[#allocation2 + $0x141] sm:$0xff] %vm330_vm0, %v323_v35  ;;  %415 = vst.msk [vmem:[#allocation2 + $0x169] sm:$0xff] %vm330_vm0, %v326_v36  ;;  %v3265_v45 = vld [vmem:[#allocation2 + $0x99] sm:$0xff]  ;;  %v467_v46 = vld [vmem:[#allocation2 + $0xc1] sm:$0xff] }
  0x41   : > { %414 = vst.msk [vmem:[#allocation2 + $0x159] sm:$0xff] %vm330_vm0, %v325_v37  ;;  %416 = vst.msk [vmem:[#allocation2 + $0x171] sm:$0xff] %vm330_vm0, %v327_v39  ;;  %v3271_v47 = vld [vmem:[#allocation2 + $0xb1] sm:$0xff]  ;;  %v469_v48 = vld [vmem:[#allocation2 + $0xd9] sm:$0xff] }
  0x42   : > { %v468_v49 = vld [vmem:[#allocation2 + $0xc9] sm:$0xff]  ;;  %v471_v50 = vld [vmem:[#allocation2 + $0xf1] sm:$0xff]  ;;  %v3291_v0 = vld [vmem:[#allocation2 + $0x1a] sm:$0xff] }
  0x43   : > { %750 = vrot.lane.b32.xlu1 %v3221_v31, %s2991_s16  ;;  %756 = vrot.lane.b32.xlu0 %v3225_v32, %s2991_s16  ;;  %v470_v51 = vld [vmem:[#allocation2 + $0xe1] sm:$0xff]  ;;  %v473_v52 = vld [vmem:[#allocation2 + $0x109] sm:$0xff]  ;;  %v3296_v2 = vld [vmem:[#allocation2 + $0x32] sm:$0xff] }
  0x44   : > { %v472_v53 = vld [vmem:[#allocation2 + $0xf9] sm:$0xff]  ;;  %v475_v54 = vld [vmem:[#allocation2 + $0x121] sm:$0xff]  ;;  %v3303_v4 = vld [vmem:[#allocation2 + $0x4a] sm:$0xff] }
  0x45   : > { %v474_v55 = vld [vmem:[#allocation2 + $0x111] sm:$0xff]  ;;  %v477_v56 = vld [vmem:[#allocation2 + $0x139] sm:$0xff]  ;;  %v3299_v3 = vld [vmem:[#allocation2 + $0x22] sm:$0xff] }
  0x46   : > { %v476_v57 = vld [vmem:[#allocation2 + $0x129] sm:$0xff]  ;;  %v479_v58 = vld [vmem:[#allocation2 + $0x151] sm:$0xff]  ;;  %v3307_v5 = vld [vmem:[#allocation2 + $0x3a] sm:$0xff] }
  0x47   : > { %754 = vrot.lane.b32.xlu1 %v3237_v38, %s2991_s16  ;;  %760 = vrot.lane.b32.xlu0 %v3245_v40, %s2991_s16  ;;  %v478_v59 = vld [vmem:[#allocation2 + $0x141] sm:$0xff]  ;;  %v481_v60 = vld [vmem:[#allocation2 + $0x169] sm:$0xff]  ;;  %v3315_v7 = vld [vmem:[#allocation2 + $0x52] sm:$0xff] }
  0x48   : > { %v480_v61 = vld [vmem:[#allocation2 + $0x159] sm:$0xff]  ;;  %v482_v63 = vld [vmem:[#allocation2 + $0x171] sm:$0xff]  ;;  %v3311_v6 = vld [vmem:[#allocation2 + $0x62] sm:$0xff] }
  0x49   : > { %v3319_v8 = vld [vmem:[#allocation2 + $0x7a] sm:$0xff]  ;;  %v3323_v9 = vld [vmem:[#allocation2 + $0x6a] sm:$0xff]  ;;  %v3327_v10 = vld [vmem:[#allocation2 + $0x92] sm:$0xff] }
  0x4a   : > { %v3331_v11 = vld [vmem:[#allocation2 + $0x82] sm:$0xff]  ;;  %v3335_v12 = vld [vmem:[#allocation2 + $0xaa] sm:$0xff]  ;;  %v3339_v13 = vld [vmem:[#allocation2 + $0x9a] sm:$0xff] }
  0x4b   : > { %758 = vrot.lane.b32.xlu1 %v3249_v41, %s2991_s16  ;;  %764 = vrot.lane.b32.xlu0 %v3253_v42, %s2991_s16  ;;  %v3343_v14 = vld [vmem:[#allocation2 + $0xc2] sm:$0xff]  ;;  %v3347_v15 = vld [vmem:[#allocation2 + $0xb2] sm:$0xff]  ;;  %v3351_v16 = vld [vmem:[#allocation2 + $0xda] sm:$0xff] }
  0x4c   : > { %v3355_v17 = vld [vmem:[#allocation2 + $0xca] sm:$0xff]  ;;  %v503_v18 = vld [vmem:[#allocation2 + $0xf2] sm:$0xff]  ;;  %v3361_v19 = vld [vmem:[#allocation2 + $0xe2] sm:$0xff] }
  0x4d   : > { %v505_v20 = vld [vmem:[#allocation2 + $0x10a] sm:$0xff]  ;;  %v504_v21 = vld [vmem:[#allocation2 + $0xfa] sm:$0xff]  ;;  %v507_v22 = vld [vmem:[#allocation2 + $0x122] sm:$0xff] }
  0x4e   : > { %v506_v23 = vld [vmem:[#allocation2 + $0x112] sm:$0xff]  ;;  %v509_v24 = vld [vmem:[#allocation2 + $0x13a] sm:$0xff]  ;;  %v508_v29 = vld [vmem:[#allocation2 + $0x12a] sm:$0xff] }
  0x4f   : > { %762 = vrot.lane.b32.xlu1 %v3257_v43, %s2991_s16  ;;  %768 = vrot.lane.b32.xlu0 %v3261_v44, %s2991_s16  ;;  %v511_v33 = vld [vmem:[#allocation2 + $0x152] sm:$0xff]  ;;  %v510_v35 = vld [vmem:[#allocation2 + $0x142] sm:$0xff]  ;;  %v513_v37 = vld [vmem:[#allocation2 + $0x16a] sm:$0xff] }
  0x53   : > { %766 = vrot.lane.b32.xlu1 %v3265_v45, %s2991_s16  ;;  %772 = vrot.lane.b32.xlu0 %v467_v46, %s2991_s16  ;;  %v512_v46 = vld [vmem:[#allocation2 + $0x15a] sm:$0xff] }
  0x57   : > { %770 = vrot.lane.b32.xlu1 %v3271_v47, %s2991_s16  ;;  %776 = vrot.lane.b32.xlu0 %v469_v48, %s2991_s16 }
  0x5b   : > { %774 = vrot.lane.b32.xlu1 %v468_v49, %s2991_s16  ;;  %780 = vrot.lane.b32.xlu0 %v471_v50, %s2991_s16  ;;  %v3388_v50 = vld [vmem:[#allocation2 + $0x18] sm:$0xff] }
  0x5f   : > { %778 = vrot.lane.b32.xlu1 %v470_v51, %s2991_s16  ;;  %784 = vrot.lane.b32.xlu0 %v473_v52, %s2991_s16  ;;  %v514_v51 = vld [vmem:[#allocation2 + $0x172] sm:$0xff] }
  0x63   : > { %782 = vrot.lane.b32.xlu1 %v472_v53, %s2991_s16  ;;  %788 = vrot.lane.b32.xlu0 %v475_v54, %s2991_s16  ;;  %v3397_v54 = vld [vmem:[#allocation2 + $0x30] sm:$0xff] }
  0x67   : > { %786 = vrot.lane.b32.xlu1 %v474_v55, %s2991_s16  ;;  %792 = vrot.lane.b32.xlu0 %v477_v56, %s2991_s16  ;;  %v3403_v56 = vld [vmem:[#allocation2 + $0x20] sm:$0xff] }
  0x6b   : > { %790 = vrot.lane.b32.xlu1 %v476_v57, %s2991_s16  ;;  %796 = vrot.lane.b32.xlu0 %v479_v58, %s2991_s16  ;;  %v3409_v58 = vld [vmem:[#allocation2 + $0x48] sm:$0xff] }
  0x6f   : > { %794 = vrot.lane.b32.xlu1 %v478_v59, %s2991_s16  ;;  %800 = vrot.lane.b32.xlu0 %v481_v60, %s2991_s16  ;;  %v3415_v60 = vld [vmem:[#allocation2 + $0x38] sm:$0xff] }
  0x73   : > { %798 = vrot.lane.b32.xlu1 %v480_v61, %s2991_s16  ;;  %868 = vrot.lane.b32.xlu0 %v483_v62, %s2992_s17  ;;  %v3421_v62 = vld [vmem:[#allocation2 + $0x60] sm:$0xff] }
  0x77   : > { %802 = vrot.lane.b32.xlu1 %v482_v63, %s2991_s16  ;;  %872 = vrot.lane.b32.xlu0 %v3291_v0, %s2992_s17  ;;  %s2996_s16 = smov 24  }
  0x7b   : > { %870 = vrot.lane.b32.xlu1 %v484_v1, %s2992_s17  ;;  %876 = vrot.lane.b32.xlu0 %v3296_v2, %s2992_s17  ;;  %v3427_v1 = vld [vmem:[#allocation2 + $0x50] sm:$0xff] }
  0x7f   : > { %874 = vrot.lane.b32.xlu1 %v3299_v3, %s2992_s17  ;;  %880 = vrot.lane.b32.xlu0 %v3303_v4, %s2992_s17 }
  0x83   : > { %878 = vrot.lane.b32.xlu1 %v3307_v5, %s2992_s17  ;;  %884 = vrot.lane.b32.xlu0 %v3311_v6, %s2992_s17 }
  0x87   : > { %882 = vrot.lane.b32.xlu1 %v3315_v7, %s2992_s17  ;;  %888 = vrot.lane.b32.xlu0 %v3319_v8, %s2992_s17 }
  0x8b   : > { %886 = vrot.lane.b32.xlu1 %v3323_v9, %s2992_s17  ;;  %892 = vrot.lane.b32.xlu0 %v3327_v10, %s2992_s17 }
  0x8f   : > { %890 = vrot.lane.b32.xlu1 %v3331_v11, %s2992_s17  ;;  %896 = vrot.lane.b32.xlu0 %v3335_v12, %s2992_s17 }
  0x93   : > { %894 = vrot.lane.b32.xlu1 %v3339_v13, %s2992_s17  ;;  %900 = vrot.lane.b32.xlu0 %v3343_v14, %s2992_s17  ;;  %v3369_v28 = vpop.permute.xlu0 %740 }
  0x97   : > { %898 = vrot.lane.b32.xlu1 %v3347_v15, %s2992_s17  ;;  %904 = vrot.lane.b32.xlu0 %v3351_v16, %s2992_s17 }
  0x9b   : > { %902 = vrot.lane.b32.xlu1 %v3355_v17, %s2992_s17  ;;  %908 = vrot.lane.b32.xlu0 %v503_v18, %s2992_s17 }
  0x9f   : > { %906 = vrot.lane.b32.xlu1 %v3361_v19, %s2992_s17  ;;  %912 = vrot.lane.b32.xlu0 %v505_v20, %s2992_s17  ;;  %v3433_v20 = vld [vmem:[#allocation2 + $0x78] sm:$0xff] }
  0xa3   : > { %910 = vrot.lane.b32.xlu1 %v504_v21, %s2992_s17  ;;  %916 = vrot.lane.b32.xlu0 %v507_v22, %s2992_s17  ;;  %v3439_v22 = vld [vmem:[#allocation2 + $0x68] sm:$0xff] }
  0xa4   : > { %v3373_v34 = vpop.permute.xlu0 %742 }
  0xa7   : > { %914 = vrot.lane.b32.xlu1 %v506_v23, %s2992_s17  ;;  %920 = vrot.lane.b32.xlu0 %v509_v24, %s2992_s17  ;;  %v3445_v24 = vld [vmem:[#allocation2 + $0x90] sm:$0xff] }
  0xa8   : > { %4592 = vst [vmem:[#allocation13_spill] sm:$0xff] %v3445_v24 }
  0xab   : > { %918 = vrot.lane.b32.xlu1 %v508_v29, %s2992_s17  ;;  %924 = vrot.lane.b32.xlu0 %v511_v33, %s2992_s17  ;;  %v3451_v33 = vld [vmem:[#allocation2 + $0x80] sm:$0xff] }
  0xad   : > { %v3377_v36 = vpop.permute.xlu1 %744  ;;  %v3379_v39 = vpop.permute.xlu0 %748 }
  0xaf   : > { %922 = vrot.lane.b32.xlu1 %v510_v35, %s2992_s17  ;;  %928 = vrot.lane.b32.xlu0 %v513_v37, %s2992_s17  ;;  %v3457_v37 = vld [vmem:[#allocation2 + $0xa8] sm:$0xff] }
  0xb0   : > { %4595 = vst [vmem:[#allocation16_spill] sm:$0xff] %v3457_v37 }
  0xb1   : > { %v3383_v48 = vpop.permute.xlu1 %746  ;;  %v3385_v49 = vpop.permute.xlu0 %752 }
  0xb3   : > { %926 = vrot.lane.b32.xlu1 %v512_v46, %s2992_s17  ;;  %996 = vrot.lane.b32.xlu0 %v3388_v50, %s2993_s18 }
  0xb5   : > { %v3392_v52 = vpop.permute.xlu1 %750  ;;  %v3394_v53 = vpop.permute.xlu0 %756 }
  0xb7   : > { %930 = vrot.lane.b32.xlu1 %v514_v51, %s2992_s17  ;;  %1000 = vrot.lane.b32.xlu0 %v3397_v54, %s2993_s18  ;;  %v3463_v51 = vld [vmem:[#allocation2 + $0x98] sm:$0xff] }
  0xb8   : > { %4597 = vst [vmem:[#allocation18_spill] sm:$0xff] %v3463_v51 }
  0xb9   : > { %v3401_v55 = vpop.permute.xlu1 %754  ;;  %v3405_v57 = vpop.permute.xlu0 %760 }
  0xbb   : > { %998 = vrot.lane.b32.xlu1 %v3403_v56, %s2993_s18  ;;  %1004 = vrot.lane.b32.xlu0 %v3409_v58, %s2993_s18 }
  0xbd   : > { %v3413_v59 = vpop.permute.xlu1 %758  ;;  %v3417_v61 = vpop.permute.xlu0 %764 }
  0xbe   : > { %4588 = vst [vmem:[#allocation9_spill] sm:$0xff] %v3417_v61 }
  0xbf   : > { %1002 = vrot.lane.b32.xlu1 %v3415_v60, %s2993_s18  ;;  %1008 = vrot.lane.b32.xlu0 %v3421_v62, %s2993_s18 }
  0xc1   : > { %v3425_v63 = vpop.permute.xlu1 %762  ;;  %v3429_v18 = vpop.permute.xlu0 %768 }
  0xc2   : > { %4589 = vst [vmem:[#allocation10_spill] sm:$0xff] %v3429_v18 }
  0xc3   : > { %1006 = vrot.lane.b32.xlu1 %v3427_v1, %s2993_s18  ;;  %1012 = vrot.lane.b32.xlu0 %v3433_v20, %s2993_s18 }
  0xc5   : > { %v3437_v21 = vpop.permute.xlu1 %766  ;;  %v3441_v23 = vpop.permute.xlu0 %772 }
  0xc6   : > { %4590 = vst [vmem:[#allocation11_spill] sm:$0xff] %v3437_v21  ;;  %4591 = vst [vmem:[#allocation12_spill] sm:$0xff] %v3441_v23 }
  0xc7   : > { %1010 = vrot.lane.b32.xlu1 %v3439_v22, %s2993_s18  ;;  %1016 = vrot.lane.b32.xlu0 %v3445_v24, %s2993_s18 }
  0xc9   : > { %v3449_v29 = vpop.permute.xlu1 %770  ;;  %v3453_v35 = vpop.permute.xlu0 %776 }
  0xca   : > { %4593 = vst [vmem:[#allocation14_spill] sm:$0xff] %v3449_v29  ;;  %4594 = vst [vmem:[#allocation15_spill] sm:$0xff] %v3453_v35  ;;  %v1995_v29 = vld [vmem:[%s4575_s1] sm:$0xff] }
  0xcb   : > { %1014 = vrot.lane.b32.xlu1 %v3451_v33, %s2993_s18  ;;  %1020 = vrot.lane.b32.xlu0 %v3457_v37, %s2993_s18 }
  0xcd   : > { %v3461_v46 = vpop.permute.xlu1 %774  ;;  %v3465_v23 = vpop.permute.xlu0 %780 }
  0xce   : > { %4596 = vst [vmem:[#allocation17_spill] sm:$0xff] %v3461_v46  ;;  %4598 = vst [vmem:[#allocation19_spill] sm:$0xff] %v3465_v23  ;;  %v1996_v46 = vld [vmem:[%s4575_s1 + $0x8] sm:$0xff] }
  0xcf   : > { %1018 = vrot.lane.b32.xlu1 %v3463_v51, %s2993_s18  ;;  %1126 = vrot.lane.b32.xlu0 %v3209_v27, %s2994_s19  ;;  %v2827_v23 = vpack.c.bf16 %v1996_v46, %v1995_v29 }
  0xd1   : > { %v3471_v35 = vpop.permute.xlu1 %778  ;;  %v3479_v18 = vpop.permute.xlu0 %784  ;;  %2828 = vmatprep.subr.bf16.mxu0 %v2827_v23  ;;  %2835 = vmatprep.subr.bf16.mxu1 %v2827_v23 }
  0xd2   : > { %4599 = vst [vmem:[#allocation20_spill] sm:$0xff] %v3471_v35  ;;  %4600 = vst [vmem:[#allocation21_spill] sm:$0xff] %v3479_v18  ;;  %2830 = vmatpush3.bf16.msra.mxu0 %v2827_v23  ;;  %v1997_v35 = vld [vmem:[%s4575_s1 + $0x10] sm:$0xff]  ;;  %v1998_v18 = vld [vmem:[%s4575_s1 + $0x18] sm:$0xff]  ;;  %2838 = vmatpush3.bf16.msra.mxu1 %v2827_v23 }
  0xd3   : > { %1124 = vrot.lane.b32.xlu1 %v3200_v25, %s2994_s19  ;;  %1254 = vrot.lane.b32.xlu0 %v3299_v3, %s2995_s27  ;;  %v2831_v25 = vpack.c.bf16 %v1998_v18, %v1997_v35 }
  0xd5   : > { %v3485_v27 = vpop.permute.xlu1 %782  ;;  %v3493_v21 = vpop.permute.xlu0 %788  ;;  %2832 = vmatprep.subr.bf16.mxu0 %v2831_v25  ;;  %2836 = vmatprep.subr.bf16.mxu1 %v2831_v25 }
  0xd6   : > { %4601 = vst [vmem:[#allocation22_spill] sm:$0xff] %v3485_v27  ;;  %4602 = vst [vmem:[#allocation23_spill] sm:$0xff] %v3493_v21  ;;  %2834 = vmatpush3.bf16.msra.mxu0 %v2831_v25  ;;  %2839 = vmatpush3.bf16.msra.mxu1 %v2831_v25 }
  0xd7   : > { %1252 = vrot.lane.b32.xlu1 %v3291_v0, %s2995_s27  ;;  %1382 = vrot.lane.b32.xlu0 %v3415_v60, %s2996_s16  ;;  %v1999_v0 = vld [vmem:[%s4575_s1 + $0x20] sm:$0xf] }
  0xd8   : > { %2777 = vmatprep.subr.msk.mxu0 %vm2104_vm2, %v1999_v0  ;;  %2837 = vmatprep.subr.msk.mxu1 %vm2104_vm2, %v1999_v0 }
  0xd9   : > { %v3499_v3 = vpop.permute.xlu1 %786  ;;  %v3501_v29 = vpop.permute.xlu0 %792 }
  0xda   : > { %4603 = vst [vmem:[#allocation24_spill] sm:$0xff] %v3499_v3  ;;  %4604 = vst [vmem:[#allocation25_spill] sm:$0xff] %v3501_v29  ;;  %2778 = vmatpush3.msk.msra.mxu0 %vm2104_vm2, %v1999_v0  ;;  %2840 = vmatpush3.msk.msra.mxu1 %vm2104_vm2, %v1999_v0 }
  0xdb   : > { %1380 = vrot.lane.b32.xlu1 %v3397_v54, %s2996_s16  ;;  %1128 = vrot.lane.b32.xlu0 %v3202_v26, %s2994_s19 }
  0xdd   : > { %v3510_v18 = vpop.permute.xlu1 %790  ;;  %v3512_v23 = vpop.permute.xlu0 %796 }
  0xde   : > { %4605 = vst [vmem:[#allocation26_spill] sm:$0xff] %v3510_v18  ;;  %4606 = vst [vmem:[#allocation27_spill] sm:$0xff] %v3512_v23 }
  0xdf   : > { %1508 = vrot.lane.b32.xlu1 %v3202_v26, %s2997_s21  ;;  %1636 = vrot.lane.b32.xlu0 %v3296_v2, %s2998_s22 }
  0xe1   : > { %v3518_v35 = vpop.permute.xlu1 %794  ;;  %v3520_v46 = vpop.permute.xlu0 %800 }
  0xe2   : > { %4607 = vst [vmem:[#allocation28_spill] sm:$0xff] %v3518_v35  ;;  %4608 = vst [vmem:[#allocation29_spill] sm:$0xff] %v3520_v46 }
  0xe3   : > { %1510 = vrot.lane.b32.xlu1 %v3221_v31, %s2997_s21  ;;  %1256 = vrot.lane.b32.xlu0 %v3296_v2, %s2995_s27 }
  0xe5   : > { %v3526_v25 = vpop.permute.xlu1 %798  ;;  %v3528_v23 = vpop.permute.xlu0 %868 }
  0xe6   : > { %4609 = vst [vmem:[#allocation30_spill] sm:$0xff] %v3526_v25 }
  0xe7   : > { %1130 = vrot.lane.b32.xlu1 %v3221_v31, %s2994_s19  ;;  %1258 = vrot.lane.b32.xlu0 %v3307_v5, %s2995_s27 }
  0xe9   : > { %v3534_v26 = vpop.permute.xlu1 %802  ;;  %v3536_v0 = vpop.permute.xlu0 %872 }
  0xea   : > { %4610 = vst [vmem:[#allocation31_spill] sm:$0xff] %v3534_v26 }
  0xeb   : > { %1638 = vrot.lane.b32.xlu1 %v3307_v5, %s2998_s22  ;;  %1386 = vrot.lane.b32.xlu0 %v3427_v1, %s2996_s16 }
  0xed   : > { %v3542_v2 = vpop.permute.xlu1 %870  ;;  %v3544_v46 = vpop.permute.xlu0 %876 }
  0xef   : > { %1384 = vrot.lane.b32.xlu1 %v3409_v58, %s2996_s16  ;;  %1132 = vrot.lane.b32.xlu0 %v3217_v30, %s2994_s19 }
  0xf1   : > { %v3550_v31 = vpop.permute.xlu1 %874  ;;  %v3552_v26 = vpop.permute.xlu0 %880 }
  0xf3   : > { %1512 = vrot.lane.b32.xlu1 %v3217_v30, %s2997_s21  ;;  %1640 = vrot.lane.b32.xlu0 %v3303_v4, %s2998_s22 }
  0xf5   : > { %v3558_v5 = vpop.permute.xlu1 %878  ;;  %v3560_v25 = vpop.permute.xlu0 %884 }
  0xf7   : > { %1514 = vrot.lane.b32.xlu1 %v3237_v38, %s2997_s21  ;;  %1260 = vrot.lane.b32.xlu0 %v3303_v4, %s2995_s27 }
  0xf9   : > { %v3566_v35 = vpop.permute.xlu1 %882  ;;  %v3568_v29 = vpop.permute.xlu0 %888 }
  0xfb   : > { %1134 = vrot.lane.b32.xlu1 %v3237_v38, %s2994_s19  ;;  %1262 = vrot.lane.b32.xlu0 %v3315_v7, %s2995_s27 }
  0xfd   : > { %v3574_v30 = vpop.permute.xlu1 %886  ;;  %v3576_v18 = vpop.permute.xlu0 %892 }
  0xfe   : > { %4611 = vst [vmem:[#allocation32_spill] sm:$0xff] %v3576_v18 }
  0xff   : > { %1642 = vrot.lane.b32.xlu1 %v3315_v7, %s2998_s22  ;;  %1390 = vrot.lane.b32.xlu0 %v3439_v22, %s2996_s16 }
 0x101   : > { %v3582_v4 = vpop.permute.xlu1 %890  ;;  %v3584_v21 = vpop.permute.xlu0 %896 }
 0x102   : > { %4612 = vst [vmem:[#allocation33_spill] sm:$0xff] %v3584_v21 }
 0x103   : > { %1388 = vrot.lane.b32.xlu1 %v3421_v62, %s2996_s16  ;;  %1136 = vrot.lane.b32.xlu0 %v3225_v32, %s2994_s19 }
 0x105   : > { %v3590_v38 = vpop.permute.xlu1 %894  ;;  %v3592_v3 = vpop.permute.xlu0 %900 }
 0x106   : > { %4613 = vst [vmem:[#allocation34_spill] sm:$0xff] %v3590_v38  ;;  %4614 = vst [vmem:[#allocation35_spill] sm:$0xff] %v3592_v3 }
 0x107   : > { %1516 = vrot.lane.b32.xlu1 %v3225_v32, %s2997_s21  ;;  %1644 = vrot.lane.b32.xlu0 %v3311_v6, %s2998_s22 }
 0x109   : > { %v3598_v7 = vpop.permute.xlu1 %898  ;;  %v3600_v27 = vpop.permute.xlu0 %904 }
 0x10a   : > { %4615 = vst [vmem:[#allocation36_spill] sm:$0xff] %v3598_v7  ;;  %4616 = vst [vmem:[#allocation37_spill] sm:$0xff] %v3600_v27 }
 0x10b   : > { %1518 = vrot.lane.b32.xlu1 %v3249_v41, %s2997_s21  ;;  %1264 = vrot.lane.b32.xlu0 %v3311_v6, %s2995_s27 }
 0x10d   : > { %v3606_v21 = vpop.permute.xlu1 %902  ;;  %v3608_v38 = vpop.permute.xlu0 %908 }
 0x10e   : > { %4617 = vst [vmem:[#allocation38_spill] sm:$0xff] %v3606_v21  ;;  %4618 = vst [vmem:[#allocation39_spill] sm:$0xff] %v3608_v38 }
 0x10f   : > { %1138 = vrot.lane.b32.xlu1 %v3249_v41, %s2994_s19  ;;  %1266 = vrot.lane.b32.xlu0 %v3323_v9, %s2995_s27 }
 0x111   : > { %v3614_v32 = vpop.permute.xlu1 %906  ;;  %v3616_v3 = vpop.permute.xlu0 %912 }
 0x112   : > { %4619 = vst [vmem:[#allocation40_spill] sm:$0xff] %v3614_v32  ;;  %4620 = vst [vmem:[#allocation41_spill] sm:$0xff] %v3616_v3 }
 0x113   : > { %1646 = vrot.lane.b32.xlu1 %v3323_v9, %s2998_s22  ;;  %1394 = vrot.lane.b32.xlu0 %v3451_v33, %s2996_s16 }
 0x115   : > { %v3622_v6 = vpop.permute.xlu1 %910  ;;  %v3624_v27 = vpop.permute.xlu0 %916 }
 0x116   : > { %4621 = vst [vmem:[#allocation42_spill] sm:$0xff] %v3622_v6  ;;  %4622 = vst [vmem:[#allocation43_spill] sm:$0xff] %v3624_v27  ;;  %v3698_v6 = vld [vmem:[#allocation2 + $0xb0] sm:$0xff] }
 0x117   : > { %1392 = vrot.lane.b32.xlu1 %v3433_v20, %s2996_s16  ;;  %1140 = vrot.lane.b32.xlu0 %v3245_v40, %s2994_s19  ;;  %4631 = vst [vmem:[#allocation52_spill] sm:$0xff] %v3698_v6 }
 0x119   : > { %v3630_v41 = vpop.permute.xlu1 %914  ;;  %v3632_v38 = vpop.permute.xlu0 %920 }
 0x11a   : > { %4623 = vst [vmem:[#allocation44_spill] sm:$0xff] %v3630_v41  ;;  %4624 = vst [vmem:[#allocation45_spill] sm:$0xff] %v3632_v38 }
 0x11b   : > { %1520 = vrot.lane.b32.xlu1 %v3245_v40, %s2997_s21  ;;  %1648 = vrot.lane.b32.xlu0 %v3319_v8, %s2998_s22 }
 0x11d   : > { %v3638_v9 = vpop.permute.xlu1 %918  ;;  %v3640_v3 = vpop.permute.xlu0 %924 }
 0x11e   : > { %4625 = vst [vmem:[#allocation46_spill] sm:$0xff] %v3638_v9  ;;  %4626 = vst [vmem:[#allocation47_spill] sm:$0xff] %v3640_v3 }
 0x11f   : > { %1522 = vrot.lane.b32.xlu1 %v3257_v43, %s2997_s21  ;;  %1268 = vrot.lane.b32.xlu0 %v3319_v8, %s2995_s27 }
 0x121   : > { %v3646_v27 = vpop.permute.xlu1 %922  ;;  %v3648_v41 = vpop.permute.xlu0 %928 }
 0x122   : > { %4627 = vst [vmem:[#allocation48_spill] sm:$0xff] %v3646_v27  ;;  %4628 = vst [vmem:[#allocation49_spill] sm:$0xff] %v3648_v41 }
 0x123   : > { %1142 = vrot.lane.b32.xlu1 %v3257_v43, %s2994_s19  ;;  %1270 = vrot.lane.b32.xlu0 %v3331_v11, %s2995_s27 }
 0x125   : > { %v3654_v40 = vpop.permute.xlu1 %926  ;;  %v997_v38 = vpop.permute.xlu0 %996 }
 0x126   : > { %4629 = vst [vmem:[#allocation50_spill] sm:$0xff] %v3654_v40 }
 0x127   : > { %1650 = vrot.lane.b32.xlu1 %v3331_v11, %s2998_s22  ;;  %1398 = vrot.lane.b32.xlu0 %v3463_v51, %s2996_s16 }
 0x129   : > { %v3660_v8 = vpop.permute.xlu1 %930  ;;  %v3662_v3 = vpop.permute.xlu0 %1000 }
 0x12a   : > { %4630 = vst [vmem:[#allocation51_spill] sm:$0xff] %v3660_v8 }
 0x12b   : > { %1396 = vrot.lane.b32.xlu1 %v3445_v24, %s2996_s16  ;;  %1144 = vrot.lane.b32.xlu0 %v3253_v42, %s2994_s19 }
 0x12d   : > { %v3668_v43 = vpop.permute.xlu1 %998  ;;  %v3670_v41 = vpop.permute.xlu0 %1004 }
 0x12f   : > { %1524 = vrot.lane.b32.xlu1 %v3253_v42, %s2997_s21  ;;  %1652 = vrot.lane.b32.xlu0 %v3327_v10, %s2998_s22 }
 0x131   : > { %v3676_v11 = vpop.permute.xlu1 %1002  ;;  %v3678_v8 = vpop.permute.xlu0 %1008 }
 0x133   : > { %1526 = vrot.lane.b32.xlu1 %v3265_v45, %s2997_s21  ;;  %1272 = vrot.lane.b32.xlu0 %v3327_v10, %s2995_s27 }
 0x135   : > { %v3684_v40 = vpop.permute.xlu1 %1006  ;;  %v3686_v27 = vpop.permute.xlu0 %1012 }
 0x137   : > { %1146 = vrot.lane.b32.xlu1 %v3265_v45, %s2994_s19  ;;  %1274 = vrot.lane.b32.xlu0 %v3339_v13, %s2995_s27 }
 0x139   : > { %v3692_v42 = vpop.permute.xlu1 %1010  ;;  %v3694_v9 = vpop.permute.xlu0 %1016 }
 0x13b   : > { %1654 = vrot.lane.b32.xlu1 %v3339_v13, %s2998_s22  ;;  %1402 = vrot.lane.b32.xlu0 %v3698_v6, %s2996_s16 }
 0x13d   : > { %v3702_v10 = vpop.permute.xlu1 %1014  ;;  %v3704_v32 = vpop.permute.xlu0 %1020 }
 0x13e   : > { %4632 = vst [vmem:[#allocation53_spill] sm:$0xff] %v3704_v32  ;;  %v419_v32 = vld [vmem:[#allocation2] sm:$0xff] }
 0x13f   : > { %1400 = vrot.lane.b32.xlu1 %v3457_v37, %s2996_s16  ;;  %1022 = vrot.lane.b32.xlu0 %v3698_v6, %s2993_s18  ;;  %v1732_v51 = vsel %vm330_vm0, %v419_v32, %v3369_v28 }
 0x140   : > { %v1765_v18 = vsel %vm1764_vm3, %v1732_v51, %v3528_v23 }
 0x141   : > { %v3710_v45 = vpop.permute.xlu1 %1018  ;;  %v1127_v21 = vpop.permute.xlu0 %1126  ;;  %v1798_v24 = vsel %vm1797_vm4, %v1765_v18, %v997_v38  ;;  %v3741_v38 = vld [vmem:[#allocation2 + $0xc8] sm:$0xff] }
 0x142   : > { %4633 = vst [vmem:[#allocation54_spill] sm:$0xff] %v3710_v45  ;;  %v3732_v45 = vld [vmem:[#allocation2 + $0xc0] sm:$0xff] }
 0x143   : > { %1528 = vrot.lane.b32.xlu1 %v3261_v44, %s2997_s21  ;;  %1530 = vrot.lane.b32.xlu0 %v3271_v47, %s2997_s21 }
 0x145   : > { %v1125_v13 = vpop.permute.xlu1 %1124  ;;  %v1255_v7 = vpop.permute.xlu0 %1254 }
 0x147   : > { %1148 = vrot.lane.b32.xlu1 %v3261_v44, %s2994_s19  ;;  %1150 = vrot.lane.b32.xlu0 %v3271_v47, %s2994_s19  ;;  %v1831_v47 = vsel %vm1830_vm5, %v1798_v24, %v1125_v13 }
 0x149   : > { %v1253_v37 = vpop.permute.xlu1 %1252  ;;  %v1383_v6 = vpop.permute.xlu0 %1382 }
 0x14a   : > { %v1864_v28 = vsel %vm1863_vm6, %v1831_v47, %v1253_v37  ;;  %v656_v47 = vld [vmem:[#allocation2 + $0xc1] sm:$0xff] }
 0x14b   : > { %1656 = vrot.lane.b32.xlu1 %v3335_v12, %s2998_s22  ;;  %1658 = vrot.lane.b32.xlu0 %v3347_v15, %s2998_s22 }
 0x14d   : > { %v1381_v44 = vpop.permute.xlu1 %1380  ;;  %v1129_v61 = vpop.permute.xlu0 %1128 }
 0x14e   : > { %v1897_v51 = vsel %vm1896_vm8, %v1864_v28, %v1381_v44 }
 0x14f   : > { %1276 = vrot.lane.b32.xlu1 %v3335_v12, %s2995_s27  ;;  %1404 = vrot.lane.b32.xlu0 %v3732_v45, %s2996_s16  ;;  %v420_v12 = vld [vmem:[#allocation2 + $0x8] sm:$0xff] }
 0x150   : > { %v1733_v13 = vsel %vm330_vm0, %v420_v12, %v3373_v34 }
 0x151   : > { %v1509_v18 = vpop.permute.xlu1 %1508  ;;  %v1637_v23 = vpop.permute.xlu0 %1636 }
 0x152   : > { %v1930_v24 = vsel %vm1929_vm7, %v1897_v51, %v1509_v18 }
 0x153   : > { %1278 = vrot.lane.b32.xlu1 %v3347_v15, %s2995_s27  ;;  %v1963_v37 = vsel %vm1962_vm9, %v1930_v24, %v1637_v23  ;;  %1406 = vrot.lane.b32.xlu0 %v3741_v38, %s2996_s16  ;;  %v1766_v15 = vsel %vm1764_vm3, %v1733_v13, %v3542_v2  ;;  %v657_v24 = vld [vmem:[#allocation2 + $0xc9] sm:$0xff] }
 0x154   : > { %2779 = vmatprep.mubr.msk.f32.mxu0 %vm2007_vm10, %v1963_v37  ;;  %v1799_v28 = vsel %vm1797_vm4, %v1766_v15, %v3668_v43 }
 0x155   : > { %v1511_v32 = vpop.permute.xlu1 %1510  ;;  %v1257_v44 = vpop.permute.xlu0 %1256  ;;  %v1832_v18 = vsel %vm1830_vm5, %v1799_v28, %v1127_v21  ;;  %v1734_v21 = vsel %vm330_vm0, %v3388_v50, %v3377_v36 }
 0x156   : > { %v1865_v34 = vsel %vm1863_vm6, %v1832_v18, %v1255_v7  ;;  %v1767_v7 = vsel %vm1764_vm3, %v1734_v21, %v3536_v0 }
 0x157   : > { %1024 = vrot.lane.b32.xlu1 %v3732_v45, %s2993_s18  ;;  %1026 = vrot.lane.b32.xlu0 %v3741_v38, %s2993_s18  ;;  %v1898_v12 = vsel %vm1896_vm8, %v1865_v34, %v1383_v6 }
 0x158   : > { %v1931_v2 = vsel %vm1929_vm7, %v1898_v12, %v1511_v32  ;;  %v1800_v32 = vsel %vm1797_vm4, %v1767_v7, %v3662_v3  ;;  %v3784_v3 = vld [vmem:[#allocation2 + $0xd8] sm:$0xff]  ;;  %v659_v7 = vld [vmem:[#allocation2 + $0xe1] sm:$0xff] }
 0x159   : > { %v1131_v51 = vpop.permute.xlu1 %1130  ;;  %v1259_v23 = vpop.permute.xlu0 %1258  ;;  %v1833_v15 = vsel %vm1830_vm5, %v1800_v32, %v1129_v61 }
 0x15b   : > { %1532 = vrot.lane.b32.xlu1 %v656_v47, %s2997_s21  ;;  %1534 = vrot.lane.b32.xlu0 %v657_v24, %s2997_s21 }
 0x15d   : > { %v1639_v37 = vpop.permute.xlu1 %1638  ;;  %v1387_v13 = vpop.permute.xlu0 %1386 }
 0x15e   : > { %v1964_v43 = vsel %vm1962_vm9, %v1931_v2, %v1639_v37  ;;  %v3799_v2 = vld [vmem:[#allocation2 + $0xe0] sm:$0xff] }
 0x15f   : > { %1152 = vrot.lane.b32.xlu1 %v656_v47, %s2994_s19  ;;  %2780 = vmatmul.mubr.msk.f32.vlgmr.msra.gmra.mrb[0].mxu0 %vm2007_vm10, %v1964_v43  ;;  %v1866_v47 = vsel %vm1863_vm6, %v1833_v15, %v1257_v44  ;;  %v1735_v44 = vsel %vm330_vm0, %v3403_v56, %v3383_v48 }
 0x160   : > { %1154 = vrot.lane.b32.xlu0 %v657_v24, %s2994_s19  ;;  %v1768_v34 = vsel %vm1764_vm3, %v1735_v44, %v3550_v31 }
 0x161   : > { %v1385_v6 = vpop.permute.xlu1 %1384  ;;  %v1133_v28 = vpop.permute.xlu0 %1132 }
 0x162   : > { %v1899_v18 = vsel %vm1896_vm8, %v1866_v47, %v1385_v6 }
 0x163   : > { %1660 = vrot.lane.b32.xlu1 %v3343_v14, %s2998_s22 }
 0x164   : > { %1662 = vrot.lane.b32.xlu0 %v3355_v17, %s2998_s22 }
 0x165   : > { %v1513_v36 = vpop.permute.xlu1 %1512  ;;  %v1641_v0 = vpop.permute.xlu0 %1640 }
 0x166   : > { %v1932_v50 = vsel %vm1929_vm7, %v1899_v18, %v1513_v36 }
 0x167   : > { %1280 = vrot.lane.b32.xlu1 %v3343_v14, %s2995_s27  ;;  %v1965_v61 = vsel %vm1962_vm9, %v1932_v50, %v1641_v0  ;;  %v1801_v14 = vsel %vm1797_vm4, %v1768_v34, %v3676_v11  ;;  %v658_v11 = vld [vmem:[#allocation2 + $0xd9] sm:$0xff]  ;;  %v3843_v34 = vld [vmem:[#allocation2 + $0xf0] sm:$0xff] }
 0x168   : > { %1408 = vrot.lane.b32.xlu0 %v3784_v3, %s2996_s16  ;;  %2782 = vmatprep.mubr.msk.f32.mxu0 %vm2007_vm10, %v1965_v61  ;;  %v1834_v48 = vsel %vm1830_vm5, %v1801_v14, %v1131_v51 }
 0x169   : > { %v1515_v24 = vpop.permute.xlu1 %1514  ;;  %v1261_v12 = vpop.permute.xlu0 %1260  ;;  %v1867_v37 = vsel %vm1863_vm6, %v1834_v48, %v1259_v23  ;;  %v1736_v23 = vsel %vm330_vm0, %v3397_v54, %v3379_v39 }
 0x16a   : > { %v1900_v31 = vsel %vm1896_vm8, %v1867_v37, %v1387_v13  ;;  %v1769_v13 = vsel %vm1764_vm3, %v1736_v23, %v3544_v46 }
 0x16b   : > { %1282 = vrot.lane.b32.xlu1 %v3355_v17, %s2995_s27  ;;  %v1933_v21 = vsel %vm1929_vm7, %v1900_v31, %v1515_v24  ;;  %v1802_v15 = vsel %vm1797_vm4, %v1769_v13, %v3670_v41  ;;  %v660_v31 = vld [vmem:[#allocation2 + $0xf1] sm:$0xff] }
 0x16c   : > { %1410 = vrot.lane.b32.xlu0 %v3799_v2, %s2996_s16  ;;  %v1835_v47 = vsel %vm1830_vm5, %v1802_v15, %v1133_v28  ;;  %v1737_v28 = vsel %vm330_vm0, %v3415_v60, %v3392_v52  ;;  %v596_v60 = vld [vmem:[#allocation2 + $0xe2] sm:$0xff] }
 0x16d   : > { %v1135_v56 = vpop.permute.xlu1 %1134  ;;  %v1263_v43 = vpop.permute.xlu0 %1262  ;;  %v1868_v36 = vsel %vm1863_vm6, %v1835_v47, %v1261_v12  ;;  %v1770_v61 = vsel %vm1764_vm3, %v1737_v28, %v3558_v5  ;;  %v692_v47 = vld [vmem:[#allocation2 + $0xf2] sm:$0xff] }
 0x16e   : > { %v1803_v44 = vsel %vm1797_vm4, %v1770_v61, %v3684_v40  ;;  %v3850_v40 = vld [vmem:[#allocation2 + $0xf8] sm:$0xff] }
 0x16f   : > { %1028 = vrot.lane.b32.xlu1 %v3784_v3, %s2993_s18  ;;  %v1836_v52 = vsel %vm1830_vm5, %v1803_v44, %v1135_v56 }
 0x170   : > { %1030 = vrot.lane.b32.xlu0 %v3799_v2, %s2993_s18  ;;  %v1869_v14 = vsel %vm1863_vm6, %v1836_v52, %v1263_v43  ;;  %v1738_v43 = vsel %vm330_vm0, %v3409_v58, %v3385_v49  ;;  %v329_v58 = vld [vmem:[%s3155_s15 + $0xf8] sm:$0xff]  ;;  %v1740_v52 = vsel %vm330_vm0, %v3421_v62, %v3394_v53  ;;  %v662_v62 = vld [vmem:[#allocation2 + $0x109] sm:$0xff] }
 0x171   : > { %v1643_v17 = vpop.permute.xlu1 %1642  ;;  %v1391_v6 = vpop.permute.xlu0 %1390  ;;  %418 = vst.msk [vmem:[#allocation2 + $0x189] sm:$0xff] %vm330_vm0, %v329_v58 }
 0x172   : > { %v1966_v51 = vsel %vm1962_vm9, %v1933_v21, %v1643_v17  ;;  %v1902_v12 = vsel %vm1896_vm8, %v1869_v14, %v1391_v6  ;;  %v1771_v21 = vsel %vm1764_vm3, %v1738_v43, %v3552_v26 }
 0x173   : > { %1536 = vrot.lane.b32.xlu1 %v658_v11, %s2997_s21  ;;  %2783 = vmatmul.mubr.msk.f32.gmra.mrb[2].mxu0 %vm2007_vm10, %v1966_v51  ;;  %v1804_v51 = vsel %vm1797_vm4, %v1771_v21, %v3678_v8 }
 0x174   : > { %1538 = vrot.lane.b32.xlu0 %v659_v7, %s2997_s21 }
 0x175   : > { %v1389_v32 = vpop.permute.xlu1 %1388  ;;  %v1137_v18 = vpop.permute.xlu0 %1136 }
 0x176   : > { %v1901_v50 = vsel %vm1896_vm8, %v1868_v36, %v1389_v32  ;;  %v1837_v6 = vsel %vm1830_vm5, %v1804_v51, %v1137_v18  ;;  %v1739_v18 = vsel %vm330_vm0, %v3427_v1, %v3401_v55 }
 0x177   : > { %1156 = vrot.lane.b32.xlu1 %v658_v11, %s2994_s19  ;;  %v328_v11 = vld [vmem:[%s3155_s15 + $0xf0] sm:$0xff]  ;;  %s2544_s15 = scalar_lea.sflag [#allocation4], %s4488_s11 }
 0x178   : > { %1158 = vrot.lane.b32.xlu0 %v659_v7, %s2994_s19  ;;  %417 = vst.msk [vmem:[#allocation2 + $0x181] sm:$0xff] %vm330_vm0, %v328_v11  ;;  %v661_v7 = vld [vmem:[#allocation2 + $0xf9] sm:$0xff] }
 0x179   : > { %v1517_v39 = vpop.permute.xlu1 %1516  ;;  %v1645_v46 = vpop.permute.xlu0 %1644 }
 0x17a   : > { %v1934_v54 = vsel %vm1929_vm7, %v1901_v50, %v1517_v39  ;;  %v1772_v50 = vsel %vm1764_vm3, %v1739_v18, %v3566_v35  ;;  %v693_v39 = vld [vmem:[#allocation2 + $0xfa] sm:$0xff] }
 0x17b   : > { %1664 = vrot.lane.b32.xlu1 %v3351_v16, %s2998_s22  ;;  %v1967_v41 = vsel %vm1962_vm9, %v1934_v54, %v1645_v46  ;;  %v1805_v54 = vsel %vm1797_vm4, %v1772_v50, %v3692_v42  ;;  %v1743_v50 = vsel %vm330_vm0, %v3451_v33, %v3425_v63 }
 0x17c   : > { %1666 = vrot.lane.b32.xlu0 %v3361_v19, %s2998_s22  ;;  %2785 = vmatprep.mubr.msk.f32.mxu0 %vm2007_vm10, %v1967_v41 }
 0x17d   : > { %v1519_v0 = vpop.permute.xlu1 %1518  ;;  %v1265_v24 = vpop.permute.xlu0 %1264 }
 0x17e   : > { %v1870_v49 = vsel %vm1863_vm6, %v1837_v6, %v1265_v24  ;;  %v694_v6 = vld [vmem:[#allocation2 + $0x10a] sm:$0xff] }
 0x17f   : > { %1284 = vrot.lane.b32.xlu1 %v3351_v16, %s2995_s27  ;;  %v1935_v16 = vsel %vm1929_vm7, %v1902_v12, %v1519_v0  ;;  %v3895_v0 = vld [vmem:[#allocation2 + $0x108] sm:$0xff] }
 0x180   : > { %1412 = vrot.lane.b32.xlu0 %v3843_v34, %s2996_s16 }
 0x181   : > { %v1139_v19 = vpop.permute.xlu1 %1138  ;;  %v1267_v5 = vpop.permute.xlu0 %1266 }
 0x182   : > { %v1838_v41 = vsel %vm1830_vm5, %v1805_v54, %v1139_v19  ;;  %v1773_v19 = vsel %vm1764_vm3, %v1740_v52, %v3560_v25 }
 0x183   : > { %1286 = vrot.lane.b32.xlu1 %v596_v60, %s2995_s27  ;;  %v1871_v1 = vsel %vm1863_vm6, %v1838_v41, %v1267_v5  ;;  %v3907_v60 = vld [vmem:[#allocation2 + $0x110] sm:$0xff]  ;;  %v1806_v5 = vsel %vm1797_vm4, %v1773_v19, %v3686_v27  ;;  %v664_v41 = vld [vmem:[#allocation2 + $0x121] sm:$0xff] }
 0x184   : > { %1414 = vrot.lane.b32.xlu0 %v3850_v40, %s2996_s16 }
 0x185   : > { %v1647_v48 = vpop.permute.xlu1 %1646  ;;  %v1395_v37 = vpop.permute.xlu0 %1394 }
 0x186   : > { %v1968_v56 = vsel %vm1962_vm9, %v1935_v16, %v1647_v48  ;;  %v1904_v35 = vsel %vm1896_vm8, %v1871_v1, %v1395_v37  ;;  %v663_v37 = vld [vmem:[#allocation2 + $0x111] sm:$0xff]  ;;  %v4634_v1 = vld [vmem:[#allocation54_spill] sm:$0xff] }
 0x187   : > { %1032 = vrot.lane.b32.xlu1 %v3843_v34, %s2993_s18  ;;  %2786 = vmatmul.mubr.msk.f32.gmra.mrb[4].mxu0 %vm2007_vm10, %v1968_v56 }
 0x188   : > { %1034 = vrot.lane.b32.xlu0 %v3850_v40, %s2993_s18 }
 0x189   : > { %v1393_v17 = vpop.permute.xlu1 %1392  ;;  %v1141_v23 = vpop.permute.xlu0 %1140 }
 0x18a   : > { %v1903_v26 = vsel %vm1896_vm8, %v1870_v49, %v1393_v17  ;;  %v1839_v12 = vsel %vm1830_vm5, %v1806_v5, %v1141_v23  ;;  %v696_v5 = vld [vmem:[#allocation2 + $0x122] sm:$0xff] }
 0x18b   : > { %1540 = vrot.lane.b32.xlu1 %v660_v31, %s2997_s21 }
 0x18c   : > { %1542 = vrot.lane.b32.xlu0 %v661_v7, %s2997_s21 }
 0x18d   : > { %v1521_v13 = vpop.permute.xlu1 %1520  ;;  %v1649_v15 = vpop.permute.xlu0 %1648 }
 0x18e   : > { %v1936_v32 = vsel %vm1929_vm7, %v1903_v26, %v1521_v13 }
 0x18f   : > { %1160 = vrot.lane.b32.xlu1 %v660_v31, %s2994_s19  ;;  %v1969_v8 = vsel %vm1962_vm9, %v1936_v32, %v1649_v15  ;;  %v1741_v31 = vsel %vm330_vm0, %v3439_v22, %v3413_v59  ;;  %v695_v22 = vld [vmem:[#allocation2 + $0x112] sm:$0xff]  ;;  %v3945_v32 = vld [vmem:[#allocation2 + $0x120] sm:$0xff] }
 0x190   : > { %1162 = vrot.lane.b32.xlu0 %v661_v7, %s2994_s19  ;;  %2788 = vmatprep.mubr.msk.f32.mxu0 %vm2007_vm10, %v1969_v8  ;;  %v1774_v21 = vsel %vm1764_vm3, %v1741_v31, %v3574_v30  ;;  %v4636_v31 = vld [vmem:[#allocation13_spill] sm:$0xff] }
 0x191   : > { %v1523_v36 = vpop.permute.xlu1 %1522  ;;  %v1269_v46 = vpop.permute.xlu0 %1268  ;;  %v1807_v17 = vsel %vm1797_vm4, %v1774_v21, %v3702_v10 }
 0x192   : > { %v1937_v61 = vsel %vm1929_vm7, %v1904_v35, %v1523_v36  ;;  %v1872_v53 = vsel %vm1863_vm6, %v1839_v12, %v1269_v46  ;;  %v1742_v36 = vsel %vm330_vm0, %v3433_v20, %v3405_v57  ;;  %v1776_v46 = vsel %vm1764_vm3, %v1743_v50, %v3582_v4 }
 0x193   : > { %1668 = vrot.lane.b32.xlu1 %v692_v47, %s2998_s22  ;;  %v1775_v54 = vsel %vm1764_vm3, %v1742_v36, %v3568_v29  ;;  %v1809_v57 = vsel %vm1797_vm4, %v1776_v46, %v4634_v1 }
 0x194   : > { %1670 = vrot.lane.b32.xlu0 %v693_v39, %s2998_s22 }
 0x195   : > { %v1143_v55 = vpop.permute.xlu1 %1142  ;;  %v1271_v28 = vpop.permute.xlu0 %1270 }
 0x196   : > { %v1840_v7 = vsel %vm1830_vm5, %v1807_v17, %v1143_v55  ;;  %v1808_v55 = vsel %vm1797_vm4, %v1775_v54, %v3694_v9  ;;  %v4637_v17 = vld [vmem:[#allocation32_spill] sm:$0xff] }
 0x197   : > { %1288 = vrot.lane.b32.xlu1 %v692_v47, %s2995_s27  ;;  %v1873_v23 = vsel %vm1863_vm6, %v1840_v7, %v1271_v28  ;;  %v3952_v47 = vld [vmem:[#allocation2 + $0x128] sm:$0xff]  ;;  %v540_v7 = vld [vmem:[#allocation2 + $0x140] sm:$0xff] }
 0x198   : > { %1416 = vrot.lane.b32.xlu0 %v3895_v0, %s2996_s16  ;;  %v665_v28 = vld [vmem:[#allocation2 + $0x129] sm:$0xff] }
 0x199   : > { %v1651_v42 = vpop.permute.xlu1 %1650  ;;  %v1399_v24 = vpop.permute.xlu0 %1398 }
 0x19a   : > { %v1970_v44 = vsel %vm1962_vm9, %v1937_v61, %v1651_v42  ;;  %v1906_v30 = vsel %vm1896_vm8, %v1873_v23, %v1399_v24  ;;  %v4640_v23 = vld [vmem:[#allocation53_spill] sm:$0xff] }
 0x19b   : > { %1290 = vrot.lane.b32.xlu1 %v693_v39, %s2995_s27  ;;  %2789 = vmatmul.mubr.msk.f32.gmra.mrb[6].mxu0 %vm2007_vm10, %v1970_v44 }
 0x19c   : > { %1418 = vrot.lane.b32.xlu0 %v3907_v60, %s2996_s16 }
 0x19d   : > { %v1397_v14 = vpop.permute.xlu1 %1396  ;;  %v1145_v16 = vpop.permute.xlu0 %1144 }
 0x19e   : > { %v1905_v48 = vsel %vm1896_vm8, %v1872_v53, %v1397_v14  ;;  %v1841_v20 = vsel %vm1830_vm5, %v1808_v55, %v1145_v16  ;;  %v697_v16 = vld [vmem:[#allocation2 + $0x12a] sm:$0xff] }
 0x19f   : > { %1036 = vrot.lane.b32.xlu1 %v3895_v0, %s2993_s18 }
 0x1a0   : > { %1038 = vrot.lane.b32.xlu0 %v3907_v60, %s2993_s18 }
 0x1a1   : > { %v1525_v25 = vpop.permute.xlu1 %1524  ;;  %v1653_v43 = vpop.permute.xlu0 %1652 }
 0x1a2   : > { %v1938_v56 = vsel %vm1929_vm7, %v1905_v48, %v1525_v25  ;;  %v634_v48 = vld [vmem:[#allocation2 + $0x138] sm:$0xff] }
 0x1a3   : > { %1544 = vrot.lane.b32.xlu1 %v662_v62, %s2997_s21  ;;  %v1971_v27 = vsel %vm1962_vm9, %v1938_v56, %v1653_v43  ;;  %v3997_v43 = vld [vmem:[#allocation2 + $0x140] sm:$0xff] }
 0x1a4   : > { %1546 = vrot.lane.b32.xlu0 %v663_v37, %s2997_s21  ;;  %2791 = vmatprep.mubr.msk.f32.mxu0 %vm2007_vm10, %v1971_v27  ;;  %v4635_v27 = vld [vmem:[#allocation9_spill] sm:$0xff] }
 0x1a5   : > { %v1527_v11 = vpop.permute.xlu1 %1526  ;;  %v1273_v51 = vpop.permute.xlu0 %1272 }
 0x1a6   : > { %v1939_v58 = vsel %vm1929_vm7, %v1906_v30, %v1527_v11  ;;  %v1874_v29 = vsel %vm1863_vm6, %v1841_v20, %v1273_v51  ;;  %v1744_v11 = vsel %vm330_vm0, %v4636_v31, %v4635_v27 }
 0x1a7   : > { %1164 = vrot.lane.b32.xlu1 %v662_v62, %s2994_s19  ;;  %v1777_v51 = vsel %vm1764_vm3, %v1744_v11, %v4637_v17  ;;  %v4647_v11 = vld [vmem:[#allocation36_spill] sm:$0xff] }
 0x1a8   : > { %1166 = vrot.lane.b32.xlu0 %v663_v37, %s2994_s19 }
 0x1a9   : > { %v1147_v59 = vpop.permute.xlu1 %1146  ;;  %v1275_v49 = vpop.permute.xlu0 %1274 }
 0x1aa   : > { %v1842_v33 = vsel %vm1830_vm5, %v1809_v57, %v1147_v59  ;;  %v4639_v59 = vld [vmem:[#allocation18_spill] sm:$0xff] }
 0x1ab   : > { %1672 = vrot.lane.b32.xlu1 %v694_v6, %s2998_s22  ;;  %v1875_v9 = vsel %vm1863_vm6, %v1842_v33, %v1275_v49  ;;  %v1810_v49 = vsel %vm1797_vm4, %v1777_v51, %v4640_v23  ;;  %v668_v51 = vld [vmem:[#allocation2 + $0x151] sm:$0xff] }
 0x1ac   : > { %1674 = vrot.lane.b32.xlu0 %v695_v22, %s2998_s22 }
 0x1ad   : > { %v1655_v10 = vpop.permute.xlu1 %1654  ;;  %v1403_v13 = vpop.permute.xlu0 %1402 }
 0x1ae   : > { %v1972_v26 = vsel %vm1962_vm9, %v1939_v58, %v1655_v10  ;;  %v1908_v44 = vsel %vm1896_vm8, %v1875_v9, %v1403_v13  ;;  %v4641_v58 = vld [vmem:[#allocation34_spill] sm:$0xff] }
 0x1af   : > { %1292 = vrot.lane.b32.xlu1 %v694_v6, %s2995_s27  ;;  %2792 = vmatmul.mubr.msk.f32.gmra.mrb[8].mxu0 %vm2007_vm10, %v1972_v26  ;;  %v4638_v6 = vld [vmem:[#allocation11_spill] sm:$0xff]  ;;  %v666_v13 = vld [vmem:[#allocation2 + $0x139] sm:$0xff] }
 0x1b0   : > { %1420 = vrot.lane.b32.xlu0 %v3945_v32, %s2996_s16 }
 0x1b1   : > { %v1401_v15 = vpop.permute.xlu1 %1400  ;;  %v3949_v8 = vpop.permute.xlu0 %1022 }
 0x1b2   : > { %v1907_v4 = vsel %vm1896_vm8, %v1874_v29, %v1401_v15 }
 0x1b3   : > { %1294 = vrot.lane.b32.xlu1 %v695_v22, %s2995_s27  ;;  %v1745_v22 = vsel %vm330_vm0, %v4639_v59, %v4638_v6 }
 0x1b4   : > { %1422 = vrot.lane.b32.xlu0 %v3952_v47, %s2996_s16  ;;  %v1778_v10 = vsel %vm1764_vm3, %v1745_v22, %v4641_v58 }
 0x1b5   : > { %v1529_v18 = vpop.permute.xlu1 %1528  ;;  %v1531_v39 = vpop.permute.xlu0 %1530  ;;  %v1811_v15 = vsel %vm1797_vm4, %v1778_v10, %v3949_v8 }
 0x1b6   : > { %v1940_v61 = vsel %vm1929_vm7, %v1907_v4, %v1529_v18  ;;  %v1941_v52 = vsel %vm1929_vm7, %v1908_v44, %v1531_v39  ;;  %v667_v39 = vld [vmem:[#allocation2 + $0x141] sm:$0xff] }
 0x1b7   : > { %1040 = vrot.lane.b32.xlu1 %v3945_v32, %s2993_s18 }
 0x1b8   : > { %1042 = vrot.lane.b32.xlu0 %v3952_v47, %s2993_s18 }
 0x1b9   : > { %v1149_v63 = vpop.permute.xlu1 %1148  ;;  %v1151_v35 = vpop.permute.xlu0 %1150 }
 0x1ba   : > { %v1843_v26 = vsel %vm1830_vm5, %v1810_v49, %v1149_v63  ;;  %v1844_v50 = vsel %vm1830_vm5, %v1811_v15, %v1151_v35  ;;  %v699_v35 = vld [vmem:[#allocation2 + $0x142] sm:$0xff] }
 0x1bb   : > { %1548 = vrot.lane.b32.xlu1 %v664_v41, %s2997_s21 }
 0x1bc   : > { %1550 = vrot.lane.b32.xlu0 %v665_v28, %s2997_s21 }
 0x1bd   : > { %v1657_v42 = vpop.permute.xlu1 %1656  ;;  %v1659_v19 = vpop.permute.xlu0 %1658 }
 0x1be   : > { %v1973_v24 = vsel %vm1962_vm9, %v1940_v61, %v1657_v42  ;;  %v1974_v14 = vsel %vm1962_vm9, %v1941_v52, %v1659_v19  ;;  %v636_v61 = vld [vmem:[#allocation2 + $0x150] sm:$0xff]  ;;  %v4642_v19 = vld [vmem:[#allocation10_spill] sm:$0xff] }
 0x1bf   : > { %1168 = vrot.lane.b32.xlu1 %v664_v41, %s2994_s19  ;;  %2794 = vmatprep.mubr.msk.f32.mxu0 %vm2007_vm10, %v1973_v24  ;;  %v637_v24 = vld [vmem:[#allocation2 + $0x158] sm:$0xff] }
 0x1c0   : > { %1170 = vrot.lane.b32.xlu0 %v665_v28, %s2994_s19  ;;  %2795 = vmatmul.mubr.msk.f32.gmra.mrb[10].mxu0 %vm2007_vm10, %v1974_v14  ;;  %v698_v28 = vld [vmem:[#allocation2 + $0x13a] sm:$0xff]  ;;  %v4643_v14 = vld [vmem:[#allocation16_spill] sm:$0xff] }
 0x1c1   : > { %v1277_v12 = vpop.permute.xlu1 %1276  ;;  %v1405_v53 = vpop.permute.xlu0 %1404 }
 0x1c2   : > { %v1876_v18 = vsel %vm1863_vm6, %v1843_v26, %v1277_v12 }
 0x1c3   : > { %1676 = vrot.lane.b32.xlu1 %v696_v5, %s2998_s22  ;;  %v1909_v41 = vsel %vm1896_vm8, %v1876_v18, %v1405_v53 }
 0x1c4   : > { %1678 = vrot.lane.b32.xlu0 %v697_v16, %s2998_s22 }
 0x1c5   : > { %v1279_v62 = vpop.permute.xlu1 %1278  ;;  %v1407_v25 = vpop.permute.xlu0 %1406 }
 0x1c6   : > { %v1877_v54 = vsel %vm1863_vm6, %v1844_v50, %v1279_v62  ;;  %v4645_v62 = vld [vmem:[#allocation14_spill] sm:$0xff] }
 0x1c7   : > { %1296 = vrot.lane.b32.xlu1 %v696_v5, %s2995_s27  ;;  %v1910_v1 = vsel %vm1896_vm8, %v1877_v54, %v1407_v25  ;;  %v1746_v5 = vsel %vm330_vm0, %v4643_v14, %v4642_v19  ;;  %v670_v19 = vld [vmem:[#allocation2 + $0x169] sm:$0xff] }
 0x1c8   : > { %1424 = vrot.lane.b32.xlu0 %v634_v48, %s2996_s16 }
 0x1c9   : > { %v1025_v56 = vpop.permute.xlu1 %1024  ;;  %v3994_v37 = vpop.permute.xlu0 %1026 }
 0x1cb   : > { %1298 = vrot.lane.b32.xlu1 %v697_v16, %s2995_s27  ;;  %v4644_v16 = vld [vmem:[#allocation33_spill] sm:$0xff] }
 0x1cc   : > { %1426 = vrot.lane.b32.xlu0 %v3997_v43, %s2996_s16  ;;  %v1779_v53 = vsel %vm1764_vm3, %v1746_v5, %v4644_v16  ;;  %v671_v16 = vld [vmem:[#allocation2 + $0x171] sm:$0xff] }
 0x1cd   : > { %v1533_v21 = vpop.permute.xlu1 %1532  ;;  %v1535_v30 = vpop.permute.xlu0 %1534  ;;  %v1812_v27 = vsel %vm1797_vm4, %v1779_v53, %v1025_v56  ;;  %v669_v56 = vld [vmem:[#allocation2 + $0x159] sm:$0xff] }
 0x1ce   : > { %v1942_v55 = vsel %vm1929_vm7, %v1909_v41, %v1533_v21  ;;  %v1943_v63 = vsel %vm1929_vm7, %v1910_v1, %v1535_v30  ;;  %v638_v41 = vld [vmem:[#allocation2 + $0x168] sm:$0xff]  ;;  %v639_v1 = vld [vmem:[#allocation2 + $0x170] sm:$0xff] }
 0x1cf   : > { %1044 = vrot.lane.b32.xlu1 %v634_v48, %s2993_s18  ;;  %v4646_v48 = vld [vmem:[#allocation52_spill] sm:$0xff] }
 0x1d0   : > { %1046 = vrot.lane.b32.xlu0 %v540_v7, %s2993_s18  ;;  %v1747_v25 = vsel %vm330_vm0, %v4646_v48, %v4645_v62 }
 0x1d1   : > { %v1153_v36 = vpop.permute.xlu1 %1152  ;;  %v1780_v21 = vsel %vm1764_vm3, %v1747_v25, %v4647_v11 }
 0x1d2   : > { %v1155_v46 = vpop.permute.xlu0 %1154  ;;  %v1845_v17 = vsel %vm1830_vm5, %v1812_v27, %v1153_v36  ;;  %v1813_v7 = vsel %vm1797_vm4, %v1780_v21, %v3994_v37  ;;  %v700_v36 = vld [vmem:[#allocation2 + $0x152] sm:$0xff] }
 0x1d3   : > { %1552 = vrot.lane.b32.xlu1 %v666_v13, %s2997_s21  ;;  %v1846_v22 = vsel %vm1830_vm5, %v1813_v7, %v1155_v46  ;;  %v703_v7 = vld [vmem:[#allocation2 + $0x172] sm:$0xff] }
 0x1d4   : > { %1554 = vrot.lane.b32.xlu0 %v667_v39, %s2997_s21 }
 0x1d5   : > { %v1661_v8 = vpop.permute.xlu1 %1660 }
 0x1d6   : > { %v1975_v57 = vsel %vm1962_vm9, %v1942_v55, %v1661_v8  ;;  %v1663_v20 = vpop.permute.xlu0 %1662 }
 0x1d7   : > { %1172 = vrot.lane.b32.xlu1 %v666_v13, %s2994_s19  ;;  %2797 = vmatprep.mubr.msk.f32.mxu0 %vm2007_vm10, %v1975_v57  ;;  %v1976_v33 = vsel %vm1962_vm9, %v1943_v63, %v1663_v20  ;;  %v4648_v63 = vld [vmem:[#allocation12_spill] sm:$0xff] }
 0x1d8   : > { %1174 = vrot.lane.b32.xlu0 %v667_v39, %s2994_s19  ;;  %2798 = vmatmul.mubr.msk.f32.gmra.mrb[12].mxu0 %vm2007_vm10, %v1976_v33  ;;  %v701_v39 = vld [vmem:[#allocation2 + $0x15a] sm:$0xff]  ;;  %v1748_v20 = vsel %vm330_vm0, %v3732_v45, %v4648_v63  ;;  %v673_v63 = vld [vmem:[#allocation2 + $0x189] sm:$0xff] }
 0x1d9   : > { %v1281_v29 = vpop.permute.xlu1 %1280 }
 0x1da   : > { %v1409_v4 = vpop.permute.xlu0 %1408  ;;  %v1878_v6 = vsel %vm1863_vm6, %v1845_v17, %v1281_v29  ;;  %v702_v17 = vld [vmem:[#allocation2 + $0x16a] sm:$0xff] }
 0x1db   : > { %1680 = vrot.lane.b32.xlu1 %v698_v28, %s2998_s22  ;;  %v1911_v30 = vsel %vm1896_vm8, %v1878_v6, %v1409_v4 }
 0x1dc   : > { %1682 = vrot.lane.b32.xlu0 %v699_v35, %s2998_s22 }
 0x1dd   : > { %v1283_v9 = vpop.permute.xlu1 %1282 }
 0x1de   : > { %v1411_v42 = vpop.permute.xlu0 %1410  ;;  %v1879_v23 = vsel %vm1863_vm6, %v1846_v22, %v1283_v9  ;;  %v640_v22 = vld [vmem:[#allocation2 + $0x180] sm:$0xff] }
 0x1df   : > { %1300 = vrot.lane.b32.xlu1 %v698_v28, %s2995_s27  ;;  %v1912_v10 = vsel %vm1896_vm8, %v1879_v23, %v1411_v42  ;;  %v4649_v28 = vld [vmem:[#allocation35_spill] sm:$0xff]  ;;  %v4651_v42 = vld [vmem:[#allocation38_spill] sm:$0xff] }
 0x1e0   : > { %1428 = vrot.lane.b32.xlu0 %v636_v61, %s2996_s16  ;;  %v1781_v29 = vsel %vm1764_vm3, %v1748_v20, %v4649_v28 }
 0x1e1   : > { %v1029_v44 = vpop.permute.xlu1 %1028 }
 0x1e2   : > { %v1031_v52 = vpop.permute.xlu0 %1030  ;;  %v1814_v9 = vsel %vm1797_vm4, %v1781_v29, %v1029_v44 }
 0x1e3   : > { %1302 = vrot.lane.b32.xlu1 %v699_v35, %s2995_s27  ;;  %v4650_v35 = vld [vmem:[#allocation17_spill] sm:$0xff] }
 0x1e4   : > { %1430 = vrot.lane.b32.xlu0 %v637_v24, %s2996_s16  ;;  %v1749_v4 = vsel %vm330_vm0, %v3741_v38, %v4650_v35 }
 0x1e5   : > { %v1537_v12 = vpop.permute.xlu1 %1536 }
 0x1e6   : > { %v1539_v31 = vpop.permute.xlu0 %1538  ;;  %v1944_v58 = vsel %vm1929_vm7, %v1911_v30, %v1537_v12 }
 0x1e7   : > { %1048 = vrot.lane.b32.xlu1 %v636_v61, %s2993_s18  ;;  %v1945_v13 = vsel %vm1929_vm7, %v1912_v10, %v1539_v31 }
 0x1e8   : > { %1050 = vrot.lane.b32.xlu0 %v637_v24, %s2993_s18  ;;  %v1782_v24 = vsel %vm1764_vm3, %v1749_v4, %v4651_v42  ;;  %v704_v42 = vld [vmem:[#allocation2 + $0x182] sm:$0xff] }
 0x1e9   : > { %v1157_v59 = vpop.permute.xlu1 %1156  ;;  %v1815_v14 = vsel %vm1797_vm4, %v1782_v24, %v1031_v52 }
 0x1ea   : > { %v1159_v49 = vpop.permute.xlu0 %1158  ;;  %v1847_v45 = vsel %vm1830_vm5, %v1814_v9, %v1157_v59 }
 0x1eb   : > { %1556 = vrot.lane.b32.xlu1 %v668_v51, %s2997_s21  ;;  %v1848_v38 = vsel %vm1830_vm5, %v1815_v14, %v1159_v49  ;;  %v641_v49 = vld [vmem:[#allocation2 + $0x188] sm:$0xff] }
 0x1ec   : > { %1558 = vrot.lane.b32.xlu0 %v669_v56, %s2997_s21 }
 0x1ed   : > { %v1665_v37 = vpop.permute.xlu1 %1664 }
 0x1ee   : > { %v1977_v26 = vsel %vm1962_vm9, %v1944_v58, %v1665_v37  ;;  %v1667_v15 = vpop.permute.xlu0 %1666  ;;  %v4652_v58 = vld [vmem:[#allocation15_spill] sm:$0xff] }
 0x1ef   : > { %1176 = vrot.lane.b32.xlu1 %v668_v51, %s2994_s19  ;;  %2800 = vmatprep.mubr.msk.f32.mxu0 %vm2007_vm10, %v1977_v26  ;;  %v1978_v18 = vsel %vm1962_vm9, %v1945_v13, %v1667_v15  ;;  %v1750_v37 = vsel %vm330_vm0, %v3784_v3, %v4652_v58  ;;  %v4653_v26 = vld [vmem:[#allocation37_spill] sm:$0xff]  ;;  %v4654_v15 = vld [vmem:[#allocation20_spill] sm:$0xff] }
 0x1f0   : > { %1178 = vrot.lane.b32.xlu0 %v669_v56, %s2994_s19  ;;  %2801 = vmatmul.mubr.msk.f32.gmra.mrb[14].mxu0 %vm2007_vm10, %v1978_v18  ;;  %v1783_v13 = vsel %vm1764_vm3, %v1750_v37, %v4653_v26  ;;  %v1751_v18 = vsel %vm330_vm0, %v3799_v2, %v4654_v15 }
 0x1f1   : > { %v1285_v50 = vpop.permute.xlu1 %1284 }
 0x1f2   : > { %v1413_v54 = vpop.permute.xlu0 %1412  ;;  %v1880_v5 = vsel %vm1863_vm6, %v1847_v45, %v1285_v50  ;;  %v705_v45 = vld [vmem:[#allocation2 + $0x18a] sm:$0xff] }
 0x1f3   : > { %1684 = vrot.lane.b32.xlu1 %v700_v36, %s2998_s22  ;;  %v1913_v62 = vsel %vm1896_vm8, %v1880_v5, %v1413_v54  ;;  %v642_v5 = vld [vmem:[#allocation2 + $0x198] sm:$0xff] }
 0x1f4   : > { %1686 = vrot.lane.b32.xlu0 %v701_v39, %s2998_s22 }
 0x1f5   : > { %v1287_v46 = vpop.permute.xlu1 %1286 }
 0x1f6   : > { %v1415_v55 = vpop.permute.xlu0 %1414  ;;  %v1881_v44 = vsel %vm1863_vm6, %v1848_v38, %v1287_v46  ;;  %v672_v46 = vld [vmem:[#allocation2 + $0x181] sm:$0xff] }
 0x1f7   : > { %1304 = vrot.lane.b32.xlu1 %v700_v36, %s2995_s27  ;;  %v1914_v25 = vsel %vm1896_vm8, %v1881_v44, %v1415_v55 }
 0x1f8   : > { %1432 = vrot.lane.b32.xlu0 %v638_v41, %s2996_s16 }
 0x1f9   : > { %v1033_v8 = vpop.permute.xlu1 %1032 }
 0x1fa   : > { %v1035_v57 = vpop.permute.xlu0 %1034  ;;  %v1816_v36 = vsel %vm1797_vm4, %v1783_v13, %v1033_v8 }
 0x1fb   : > { %1306 = vrot.lane.b32.xlu1 %v701_v39, %s2995_s27  ;;  %v4655_v39 = vld [vmem:[#allocation40_spill] sm:$0xff] }
 0x1fc   : > { %1434 = vrot.lane.b32.xlu0 %v639_v1, %s2996_s16  ;;  %v1784_v54 = vsel %vm1764_vm3, %v1751_v18, %v4655_v39  ;;  %v707_v18 = vld [vmem:[#allocation2 + $0x1a2] sm:$0xff] }
 0x1fd   : > { %v1541_v33 = vpop.permute.xlu1 %1540 }
 0x1fe   : > { %v1543_v61 = vpop.permute.xlu0 %1542  ;;  %v1946_v48 = vsel %vm1929_vm7, %v1913_v62, %v1541_v33  ;;  %v4656_v62 = vld [vmem:[#allocation19_spill] sm:$0xff] }
 0x1ff   : > { %1052 = vrot.lane.b32.xlu1 %v638_v41, %s2993_s18  ;;  %v1947_v31 = vsel %vm1929_vm7, %v1914_v25, %v1543_v61  ;;  %v1817_v41 = vsel %vm1797_vm4, %v1784_v54, %v1035_v57  ;;  %v4657_v25 = vld [vmem:[#allocation39_spill] sm:$0xff] }
 0x200   : > { %1054 = vrot.lane.b32.xlu0 %v639_v1, %s2993_s18 }
 0x201   : > { %v1161_v12 = vpop.permute.xlu1 %1160 }
 0x202   : > { %v1163_v53 = vpop.permute.xlu0 %1162  ;;  %v1849_v3 = vsel %vm1830_vm5, %v1816_v36, %v1161_v12 }
 0x203   : > { %1560 = vrot.lane.b32.xlu1 %v670_v19, %s2997_s21  ;;  %v1850_v2 = vsel %vm1830_vm5, %v1817_v41, %v1163_v53  ;;  %v643_v53 = vld [vmem:[#allocation2 + $0x1a0] sm:$0xff] }
 0x204   : > { %1562 = vrot.lane.b32.xlu0 %v671_v16, %s2997_s21 }
 0x205   : > { %v1669_v52 = vpop.permute.xlu1 %1668 }
 0x206   : > { %v1979_v27 = vsel %vm1962_vm9, %v1946_v48, %v1669_v52  ;;  %v1671_v11 = vpop.permute.xlu0 %1670  ;;  %v1752_v48 = vsel %vm330_vm0, %v3843_v34, %v4656_v62 }
 0x207   : > { %1180 = vrot.lane.b32.xlu1 %v670_v19, %s2994_s19  ;;  %2803 = vmatprep.mubr.msk.f32.mxu1 %vm2007_vm10, %v1979_v27  ;;  %v1980_v21 = vsel %vm1962_vm9, %v1947_v31, %v1671_v11  ;;  %v1785_v27 = vsel %vm1764_vm3, %v1752_v48, %v4657_v25  ;;  %v706_v31 = vld [vmem:[#allocation2 + $0x19a] sm:$0xff]  ;;  %v4663_v25 = vld [vmem:[#allocation44_spill] sm:$0xff] }
 0x208   : > { %1182 = vrot.lane.b32.xlu0 %v671_v16, %s2994_s19  ;;  %2804 = vmatmul.mubr.msk.f32.vlgmr.msra.gmra.mrb[0].mxu1 %vm2007_vm10, %v1980_v21  ;;  %v674_v16 = vld [vmem:[#allocation2 + $0x199] sm:$0xff] }
 0x209   : > { %v1289_v51 = vpop.permute.xlu1 %1288  ;;  %v4658_v11 = vld [vmem:[#allocation22_spill] sm:$0xff] }
 0x20a   : > { %v1417_v6 = vpop.permute.xlu0 %1416  ;;  %v1882_v55 = vsel %vm1863_vm6, %v1849_v3, %v1289_v51  ;;  %v1753_v21 = vsel %vm330_vm0, %v3850_v40, %v4658_v11 }
 0x20b   : > { %1688 = vrot.lane.b32.xlu1 %v702_v17, %s2998_s22  ;;  %v1915_v33 = vsel %vm1896_vm8, %v1882_v55, %v1417_v6 }
 0x20c   : > { %1690 = vrot.lane.b32.xlu0 %v703_v7, %s2998_s22 }
 0x20d   : > { %v1291_v59 = vpop.permute.xlu1 %1290 }
 0x20e   : > { %v1419_v56 = vpop.permute.xlu0 %1418  ;;  %v1883_v8 = vsel %vm1863_vm6, %v1850_v2, %v1291_v59  ;;  %v4170_v59 = vld [vmem:[%s4576_s2] ss:$0 sm:$0xff] }
 0x20f   : > { %1308 = vrot.lane.b32.xlu1 %v702_v17, %s2995_s27  ;;  %v1916_v29 = vsel %vm1896_vm8, %v1883_v8, %v1419_v56 }
 0x210   : > { %1436 = vrot.lane.b32.xlu0 %v640_v22, %s2996_s16 }
 0x211   : > { %v1037_v23 = vpop.permute.xlu1 %1036 }
 0x212   : > { %v4110_v30 = vpop.permute.xlu0 %1038  ;;  %v1818_v17 = vsel %vm1797_vm4, %v1785_v27, %v1037_v23 }
 0x213   : > { %1310 = vrot.lane.b32.xlu1 %v703_v7, %s2995_s27  ;;  %v4659_v7 = vld [vmem:[#allocation42_spill] sm:$0xff] }
 0x214   : > { %1438 = vrot.lane.b32.xlu0 %v641_v49, %s2996_s16  ;;  %v1786_v34 = vsel %vm1764_vm3, %v1753_v21, %v4659_v7 }
 0x215   : > { %v1545_v10 = vpop.permute.xlu1 %1544  ;;  %v1819_v56 = vsel %vm1797_vm4, %v1786_v34, %v4110_v30 }
 0x216   : > { %v1547_v50 = vpop.permute.xlu0 %1546  ;;  %v1948_v28 = vsel %vm1929_vm7, %v1915_v33, %v1545_v10 }
 0x217   : > { %1056 = vrot.lane.b32.xlu1 %v640_v22, %s2993_s18  ;;  %v1949_v4 = vsel %vm1929_vm7, %v1916_v29, %v1547_v50  ;;  %v675_v22 = vld [vmem:[#allocation2 + $0x1a1] sm:$0xff] }
 0x218   : > { %1058 = vrot.lane.b32.xlu0 %v641_v49, %s2993_s18  ;;  %s2894_s18 = scalar_lea.vmem %s4500_s30, 16 }
 0x219   : > { %v1165_v1 = vpop.permute.xlu1 %1164  ;;  %p2895_p11 = scmp.ne.s32.totalorder %s4500_s30, %s2894_s18 }
 0x21a   : > { %v1167_v20 = vpop.permute.xlu0 %1166  ;;  %v1851_v6 = vsel %vm1830_vm5, %v1818_v17, %v1165_v1 }
 0x21b   : > { %1564 = vrot.lane.b32.xlu1 %v672_v46, %s2997_s21  ;;  %v1852_v49 = vsel %vm1830_vm5, %v1819_v56, %v1167_v20  ;;  %p2896_p12 = pnand %p2895_p11, %p3079_p5 }
 0x21c   : > { %1566 = vrot.lane.b32.xlu0 %v673_v63, %s2997_s21 }
 0x21d   : > { %v1673_v57 = vpop.permute.xlu1 %1672  ;;  %p2897_p13 = pneg %p2896_p12 }
 0x21e   : > { %v1981_v35 = vsel %vm1962_vm9, %v1948_v28, %v1673_v57  ;;  %v1675_v9 = vpop.permute.xlu0 %1674 }
 0x21f   : > { %1184 = vrot.lane.b32.xlu1 %v672_v46, %s2994_s19  ;;  %2806 = vmatprep.mubr.msk.f32.mxu1 %vm2007_vm10, %v1981_v35  ;;  %v1982_v61 = vsel %vm1962_vm9, %v1949_v4, %v1675_v9 }
 0x220   : > { %1186 = vrot.lane.b32.xlu0 %v673_v63, %s2994_s19  ;;  %2807 = vmatmul.mubr.msk.f32.gmra.mrb[2].mxu1 %vm2007_vm10, %v1982_v61  ;;  %s2999_s19 = smov [#allocation3]  }
 0x221   : > { %v1293_v24 = vpop.permute.xlu1 %1292  ;;  %s2898_s23 = sshll.u32 %s2999_s19, 4  ;;  %s2899_s23 = int_to_ptr.vmem [resolvable:$false] %s2898_s23 }
 0x222   : > { %v1421_v19 = vpop.permute.xlu0 %1420  ;;  %v1884_v40 = vsel %vm1863_vm6, %v1851_v6, %v1293_v24  ;;  %p2901_p0 = scmp.lt.s32.totalorder %s4500_s30, %s2899_s23 }
 0x223   : > { %1692 = vrot.lane.b32.xlu1 %v704_v42, %s2998_s22  ;;  %v1917_v13 = vsel %vm1896_vm8, %v1884_v40, %v1421_v19  ;;  %v4661_v19 = vld [vmem:[#allocation41_spill] sm:$0xff] }
 0x224   : > { %1694 = vrot.lane.b32.xlu0 %v705_v45, %s2998_s22 }
 0x225   : > { %v1295_v14 = vpop.permute.xlu1 %1294 }
 0x226   : > { %v1423_v12 = vpop.permute.xlu0 %1422  ;;  %v1885_v37 = vsel %vm1863_vm6, %v1852_v49, %v1295_v14 }
 0x227   : > { %1312 = vrot.lane.b32.xlu1 %v704_v42, %s2995_s27  ;;  %v1918_v3 = vsel %vm1896_vm8, %v1885_v37, %v1423_v12  ;;  %v4660_v42 = vld [vmem:[#allocation21_spill] sm:$0xff]  ;;  %v4662_v12 = vld [vmem:[#allocation24_spill] sm:$0xff] }
 0x228   : > { %1440 = vrot.lane.b32.xlu0 %v642_v5, %s2996_s16  ;;  %v1754_v24 = vsel %vm330_vm0, %v3895_v0, %v4660_v42  ;;  %v4666_v42 = vld [vmem:[#allocation26_spill] sm:$0xff] }
 0x229   : > { %v4148_v38 = vpop.permute.xlu1 %1040  ;;  %v1787_v14 = vsel %vm1764_vm3, %v1754_v24, %v4661_v19  ;;  %v1757_v24 = vsel %vm330_vm0, %v3952_v47, %v4666_v42 }
 0x22a   : > { %v4150_v44 = vpop.permute.xlu0 %1042 }
 0x22b   : > { %1314 = vrot.lane.b32.xlu1 %v705_v45, %s2995_s27  ;;  %s4182_s27 = scalar_lea.vmem %s4579_s5, %s2730_s12  ;;  %s2726_s12 = sshll.u32 %s3062_s26, 4 }
 0x22c   : > { %1568 = vrot.lane.b32.xlu0 %v674_v16, %s2997_s21  ;;  %v1755_v16 = vsel %vm330_vm0, %v3907_v60, %v4662_v12  ;;  %s4498_s20 = scalar_lea.hbm %s4580_s6, %s2726_s12 }
 0x22d   : > { %v1549_v52 = vpop.permute.xlu1 %1548  ;;  %v1788_v0 = vsel %vm1764_vm3, %v1755_v16, %v4663_v25 }
 0x22e   : > { %v1551_v51 = vpop.permute.xlu0 %1550  ;;  %v1950_v36 = vsel %vm1929_vm7, %v1917_v13, %v1549_v52  ;;  %v1821_v11 = vsel %vm1797_vm4, %v1788_v0, %v4150_v44 }
 0x22f   : > { %1442 = vrot.lane.b32.xlu1 %v643_v53, %s2996_s16  ;;  %v1951_v1 = vsel %vm1929_vm7, %v1918_v3, %v1551_v51  ;;  %v1820_v53 = vsel %vm1797_vm4, %v1787_v14, %v4148_v38  ;;  %v4667_v14 = vld [vmem:[#allocation46_spill] sm:$0xff] }
 0x230   : > { %1696 = vrot.lane.b32.xlu0 %v706_v31, %s2998_s22 }
 0x231   : > { %v1169_v23 = vpop.permute.xlu1 %1168 }
 0x232   : > { %v2781_v58 = vpop.f32.mrb[0].mxu0  ;;  %v1171_v10 = vpop.permute.xlu0 %1170  ;;  %v1853_v27 = vsel %vm1830_vm5, %v1820_v53, %v1169_v23 }
 0x233   : > { %v2180_v30 = vadd.f32 %v2781_v58, %v4170_v59  ;;  %v2174_v26 = vpop.f32.mrb[1].mxu0  ;;  %1570 = vrot.lane.b32.xlu1 %v675_v22, %s2997_s21  ;;  %v1854_v38 = vsel %vm1830_vm5, %v1821_v11, %v1171_v10 }
 0x234   : > { %v2175_v15 = vadd.f32 %v4170_v59, %v2174_v26 }
 0x235   : > { %2334 = vst.msk [vmem:[%s4182_s27 + $0x8] sm:$0xff] %vm1764_vm3, %v2180_v30  ;;  %v2366_v50 = vsel %vm1764_vm3, %v2180_v30, 0.0  ;;  %v2437_v39 = vmul.f32 %v2180_v30, %v2180_v30  ;;  %v1677_v54 = vpop.permute.xlu1 %1676 }
 0x236   : > { %2333 = vst.msk [vmem:[%s4182_s27] sm:$0xff] %vm1764_vm3, %v2175_v15  ;;  %v2365_v46 = vsel %vm1764_vm3, %v2175_v15, 0.0  ;;  %v2436_v41 = vmul.f32 %v2175_v15, %v2175_v15  ;;  %v1983_v55 = vsel %vm1962_vm9, %v1950_v36, %v1677_v54  ;;  %v1679_v8 = vpop.permute.xlu0 %1678 }
 0x237   : > { %v2469_v2 = vsel %vm1764_vm3, %v2437_v39, 0.0  ;;  %v2367_v63 = vadd.f32 %v2366_v50, %v2365_v46  ;;  %1698 = vrot.lane.b32.xlu1 %v707_v18, %s2998_s22  ;;  %2809 = vmatprep.mubr.msk.f32.mxu1 %vm2007_vm10, %v1983_v55  ;;  %v1984_v33 = vsel %vm1962_vm9, %v1951_v1, %v1679_v8  ;;  %v4664_v8 = vld [vmem:[#allocation23_spill] sm:$0xff]  ;;  %s4506_s22 = scalar_lea.hbm %s4581_s7, %s2726_s12 }
 0x238   : > { %v2468_v20 = vsel %vm1764_vm3, %v2436_v41, 0.0  ;;  %2810 = vmatmul.mubr.msk.f32.gmra.mrb[4].mxu1 %vm2007_vm10, %v1984_v33 }
 0x239   : > { %v2470_v28 = vadd.f32 %v2469_v2, %v2468_v20  ;;  %v1297_v57 = vpop.permute.xlu1 %1296  ;;  %v1756_v20 = vsel %vm330_vm0, %v3945_v32, %v4664_v8 }
 0x23a   : > { %v1425_v29 = vpop.permute.xlu0 %1424  ;;  %v1886_v21 = vsel %vm1863_vm6, %v1853_v27, %v1297_v57 }
 0x23b   : > { %v1919_v56 = vsel %vm1896_vm8, %v1886_v21, %v1425_v29 }
 0x23d   : > { %v1299_v35 = vpop.permute.xlu1 %1298 }
 0x23e   : > { %v1427_v4 = vpop.permute.xlu0 %1426  ;;  %v1887_v34 = vsel %vm1863_vm6, %v1854_v38, %v1299_v35 }
 0x23f   : > { %v1920_v30 = vsel %vm1896_vm8, %v1887_v34, %v1427_v4 }
 0x241   : > { %v1045_v9 = vpop.permute.xlu1 %1044 }
 0x242   : > { %v4205_v61 = vpop.permute.xlu0 %1046 }
 0x245   : > { %v1553_v45 = vpop.permute.xlu1 %1552 }
 0x246   : > { %v2784_v5 = vpop.f32.mrb[2].mxu0  ;;  %v1555_v48 = vpop.permute.xlu0 %1554  ;;  %v1952_v23 = vsel %vm1929_vm7, %v1919_v56, %v1553_v45 }
 0x247   : > { %v2190_v62 = vadd.f32 %v2784_v5, %v4170_v59  ;;  %v2184_v52 = vpop.f32.mrb[3].mxu0  ;;  %v1953_v13 = vsel %vm1929_vm7, %v1920_v30, %v1555_v48  ;;  %v1790_v5 = vsel %vm1764_vm3, %v1757_v24, %v4667_v14  ;;  %v445_v30 = vld [vmem:[#allocation2 + $0x138] sm:$0xff] }
 0x248   : > { %v2185_v31 = vadd.f32 %v4170_v59, %v2184_v52 }
 0x249   : > { %2336 = vst.msk [vmem:[%s4182_s27 + $0x18] sm:$0xff] %vm1764_vm3, %v2190_v62  ;;  %v1173_v60 = vpop.permute.xlu1 %1172  ;;  %v2439_v17 = vmul.f32 %v2190_v62, %v2190_v62  ;;  %v2370_v44 = vsel %vm1764_vm3, %v2190_v62, 0.0  ;;  %v1823_v62 = vsel %vm1797_vm4, %v1790_v5, %v4205_v61 }
 0x24a   : > { %2335 = vst.msk [vmem:[%s4182_s27 + $0x10] sm:$0xff] %vm1764_vm3, %v2185_v31  ;;  %v2368_v51 = vsel %vm1764_vm3, %v2185_v31, 0.0  ;;  %v2438_v7 = vmul.f32 %v2185_v31, %v2185_v31  ;;  %v1175_v22 = vpop.permute.xlu0 %1174 }
 0x24b   : > { %v2369_v6 = vadd.f32 %v2368_v51, %v2367_v63  ;;  %v2473_v10 = vsel %vm1764_vm3, %v2439_v17, 0.0 }
 0x24c   : > { %v2471_v40 = vsel %vm1764_vm3, %v2438_v7, 0.0 }
 0x24d   : > { %v2472_v49 = vadd.f32 %v2471_v40, %v2470_v28  ;;  %v1681_v58 = vpop.permute.xlu1 %1680  ;;  %v2371_v37 = vadd.f32 %v2370_v44, %v2369_v6  ;;  %v4665_v28 = vld [vmem:[#allocation43_spill] sm:$0xff] }
 0x24e   : > { %v1985_v26 = vsel %vm1962_vm9, %v1952_v23, %v1681_v58  ;;  %v1683_v15 = vpop.permute.xlu0 %1682  ;;  %v1789_v57 = vsel %vm1764_vm3, %v1756_v20, %v4665_v28  ;;  %v4670_v20 = vld [vmem:[#allocation28_spill] sm:$0xff] }
 0x24f   : > { %2812 = vmatprep.mubr.msk.f32.mxu1 %vm2007_vm10, %v1985_v26  ;;  %v2474_v18 = vadd.f32 %v2473_v10, %v2472_v49  ;;  %v1986_v36 = vsel %vm1962_vm9, %v1953_v13, %v1683_v15  ;;  %v1822_v45 = vsel %vm1797_vm4, %v1789_v57, %v1045_v9  ;;  %v1856_v9 = vsel %vm1830_vm5, %v1823_v62, %v1175_v22 }
 0x250   : > { %2813 = vmatmul.mubr.msk.f32.gmra.mrb[6].mxu1 %vm2007_vm10, %v1986_v36  ;;  %v1855_v12 = vsel %vm1830_vm5, %v1822_v45, %v1173_v60 }
 0x251   : > { %v1301_v50 = vpop.permute.xlu1 %1300 }
 0x252   : > { %v1429_v39 = vpop.permute.xlu0 %1428  ;;  %v1888_v48 = vsel %vm1863_vm6, %v1855_v12, %v1301_v50 }
 0x253   : > { %v1921_v21 = vsel %vm1896_vm8, %v1888_v48, %v1429_v39  ;;  %v4668_v39 = vld [vmem:[#allocation25_spill] sm:$0xff] }
 0x255   : > { %v1303_v54 = vpop.permute.xlu1 %1302 }
 0x256   : > { %v1431_v3 = vpop.permute.xlu0 %1430  ;;  %v1889_v27 = vsel %vm1863_vm6, %v1856_v9, %v1303_v54  ;;  %v1758_v54 = vsel %vm330_vm0, %v445_v30, %v4668_v39  ;;  %v4675_v39 = vld [vmem:[#allocation50_spill] sm:$0xff] }
 0x257   : > { %v1922_v61 = vsel %vm1896_vm8, %v1889_v27, %v1431_v3 }
 0x259   : > { %v4243_v46 = vpop.permute.xlu1 %1048 }
 0x25a   : > { %v2787_v41 = vpop.f32.mrb[4].mxu0  ;;  %v4246_v1 = vpop.permute.xlu0 %1050 }
 0x25b   : > { %v2200_v55 = vadd.f32 %v2787_v41, %v4170_v59  ;;  %v2194_v2 = vpop.f32.mrb[5].mxu0 }
 0x25c   : > { %v2195_v63 = vadd.f32 %v4170_v59, %v2194_v2  ;;  %v4669_v2 = vld [vmem:[#allocation45_spill] sm:$0xff] }
 0x25d   : > { %2338 = vst.msk [vmem:[%s4182_s27 + $0x28] sm:$0xff] %vm1764_vm3, %v2200_v55  ;;  %v1557_v33 = vpop.permute.xlu1 %1556  ;;  %v2441_v29 = vmul.f32 %v2200_v55, %v2200_v55  ;;  %v2374_v16 = vsel %vm1764_vm3, %v2200_v55, 0.0 }
 0x25e   : > { %2337 = vst.msk [vmem:[%s4182_s27 + $0x20] sm:$0xff] %vm1764_vm3, %v2195_v63  ;;  %v2372_v35 = vsel %vm1764_vm3, %v2195_v63, 0.0  ;;  %v2440_v4 = vmul.f32 %v2195_v63, %v2195_v63  ;;  %v1559_v32 = vpop.permute.xlu0 %1558  ;;  %v1954_v60 = vsel %vm1929_vm7, %v1921_v21, %v1557_v33  ;;  %v1791_v63 = vsel %vm1764_vm3, %v1758_v54, %v4669_v2 }
 0x25f   : > { %v2373_v19 = vadd.f32 %v2372_v35, %v2371_v37  ;;  %v2477_v0 = vsel %vm1764_vm3, %v2441_v29, 0.0  ;;  %v1955_v51 = vsel %vm1929_vm7, %v1922_v61, %v1559_v32  ;;  %v1759_v33 = vsel %vm330_vm0, %v3997_v43, %v4670_v20  ;;  %v4671_v35 = vld [vmem:[#allocation48_spill] sm:$0xff] }
 0x260   : > { %v2475_v53 = vsel %vm1764_vm3, %v2440_v4, 0.0  ;;  %v1824_v28 = vsel %vm1797_vm4, %v1791_v63, %v4243_v46  ;;  %v1792_v4 = vsel %vm1764_vm3, %v1759_v33, %v4671_v35 }
 0x261   : > { %v2476_v52 = vadd.f32 %v2475_v53, %v2474_v18  ;;  %v1177_v47 = vpop.permute.xlu1 %1176  ;;  %v2375_v25 = vadd.f32 %v2374_v16, %v2373_v19  ;;  %v1825_v24 = vsel %vm1797_vm4, %v1792_v4, %v4246_v1 }
 0x262   : > { %v1179_v31 = vpop.permute.xlu0 %1178  ;;  %v1857_v42 = vsel %vm1830_vm5, %v1824_v28, %v1177_v47 }
 0x263   : > { %v2478_v11 = vadd.f32 %v2477_v0, %v2476_v52  ;;  %v1858_v32 = vsel %vm1830_vm5, %v1825_v24, %v1179_v31 }
 0x265   : > { %v1685_v38 = vpop.permute.xlu1 %1684 }
 0x266   : > { %v1987_v17 = vsel %vm1962_vm9, %v1954_v60, %v1685_v38  ;;  %v1687_v7 = vpop.permute.xlu0 %1686 }
 0x267   : > { %2815 = vmatprep.mubr.msk.f32.mxu1 %vm2007_vm10, %v1987_v17  ;;  %v1988_v34 = vsel %vm1962_vm9, %v1955_v51, %v1687_v7 }
 0x268   : > { %2816 = vmatmul.mubr.msk.f32.gmra.mrb[8].mxu1 %vm2007_vm10, %v1988_v34 }
 0x269   : > { %v1305_v6 = vpop.permute.xlu1 %1304 }
 0x26a   : > { %v1433_v22 = vpop.permute.xlu0 %1432  ;;  %v1890_v45 = vsel %vm1863_vm6, %v1857_v42, %v1305_v6 }
 0x26b   : > { %v1923_v46 = vsel %vm1896_vm8, %v1890_v45, %v1433_v22  ;;  %v447_v22 = vld [vmem:[#allocation2 + $0x150] sm:$0xff] }
 0x26d   : > { %v1307_v56 = vpop.permute.xlu1 %1306 }
 0x26e   : > { %v2790_v44 = vpop.f32.mrb[6].mxu0  ;;  %v1435_v23 = vpop.permute.xlu0 %1434  ;;  %v1891_v43 = vsel %vm1863_vm6, %v1858_v32, %v1307_v56 }
 0x26f   : > { %v2210_v40 = vadd.f32 %v2790_v44, %v4170_v59  ;;  %v2204_v49 = vpop.f32.mrb[7].mxu0  ;;  %v1924_v16 = vsel %vm1896_vm8, %v1891_v43, %v1435_v23  ;;  %v448_v23 = vld [vmem:[#allocation2 + $0x158] sm:$0xff] }
 0x270   : > { %v2205_v58 = vadd.f32 %v4170_v59, %v2204_v49  ;;  %v4672_v49 = vld [vmem:[#allocation27_spill] sm:$0xff] }
 0x271   : > { %2340 = vst.msk [vmem:[%s4182_s27 + $0x38] sm:$0xff] %vm1764_vm3, %v2210_v40  ;;  %v4286_v37 = vpop.permute.xlu1 %1052  ;;  %v2443_v10 = vmul.f32 %v2210_v40, %v2210_v40  ;;  %v2378_v36 = vsel %vm1764_vm3, %v2210_v40, 0.0 }
 0x272   : > { %2339 = vst.msk [vmem:[%s4182_s27 + $0x30] sm:$0xff] %vm1764_vm3, %v2205_v58  ;;  %v2376_v26 = vsel %vm1764_vm3, %v2205_v58, 0.0  ;;  %v2442_v13 = vmul.f32 %v2205_v58, %v2205_v58  ;;  %v4291_v18 = vpop.permute.xlu0 %1054  ;;  %v1760_v58 = vsel %vm330_vm0, %v447_v22, %v4672_v49 }
 0x273   : > { %v2377_v15 = vadd.f32 %v2376_v26, %v2375_v25  ;;  %v2481_v8 = vsel %vm1764_vm3, %v2443_v10, 0.0  ;;  %v4673_v10 = vld [vmem:[#allocation47_spill] sm:$0xff] }
 0x274   : > { %v2479_v50 = vsel %vm1764_vm3, %v2442_v13, 0.0  ;;  %v1793_v26 = vsel %vm1764_vm3, %v1760_v58, %v4673_v10  ;;  %v4674_v13 = vld [vmem:[#allocation30_spill] sm:$0xff] }
 0x275   : > { %v2480_v3 = vadd.f32 %v2479_v50, %v2478_v11  ;;  %v1561_v41 = vpop.permute.xlu1 %1560  ;;  %v2379_v55 = vadd.f32 %v2378_v36, %v2377_v15  ;;  %v1761_v15 = vsel %vm330_vm0, %v448_v23, %v4674_v13  ;;  %v1826_v36 = vsel %vm1797_vm4, %v1793_v26, %v4286_v37 }
 0x276   : > { %v1563_v57 = vpop.permute.xlu0 %1562  ;;  %v1956_v5 = vsel %vm1929_vm7, %v1923_v46, %v1561_v41  ;;  %v1794_v54 = vsel %vm1764_vm3, %v1761_v15, %v4675_v39 }
 0x277   : > { %v2482_v29 = vadd.f32 %v2481_v8, %v2480_v3  ;;  %v1957_v1 = vsel %vm1929_vm7, %v1924_v16, %v1563_v57  ;;  %v1827_v41 = vsel %vm1797_vm4, %v1794_v54, %v4291_v18 }
 0x279   : > { %v1181_v19 = vpop.permute.xlu1 %1180 }
 0x27a   : > { %v1183_v14 = vpop.permute.xlu0 %1182  ;;  %v1859_v3 = vsel %vm1830_vm5, %v1826_v36, %v1181_v19  ;;  %v449_v19 = vld [vmem:[#allocation2 + $0x168] sm:$0xff] }
 0x27b   : > { %v1860_v63 = vsel %vm1830_vm5, %v1827_v41, %v1183_v14 }
 0x27d   : > { %v1689_v12 = vpop.permute.xlu1 %1688 }
 0x27e   : > { %v1989_v53 = vsel %vm1962_vm9, %v1956_v5, %v1689_v12  ;;  %v1691_v62 = vpop.permute.xlu0 %1690 }
 0x27f   : > { %2818 = vmatprep.mubr.msk.f32.mxu1 %vm2007_vm10, %v1989_v53  ;;  %v1990_v48 = vsel %vm1962_vm9, %v1957_v1, %v1691_v62  ;;  %v4676_v1 = vld [vmem:[#allocation29_spill] sm:$0xff] }
 0x280   : > { %2819 = vmatmul.mubr.msk.f32.gmra.mrb[10].mxu1 %vm2007_vm10, %v1990_v48  ;;  %v1762_v62 = vsel %vm330_vm0, %v449_v19, %v4676_v1 }
 0x281   : > { %v1309_v52 = vpop.permute.xlu1 %1308 }
 0x282   : > { %v2793_v47 = vpop.f32.mrb[8].mxu0  ;;  %v1437_v9 = vpop.permute.xlu0 %1436 }
 0x283   : > { %v2220_v25 = vadd.f32 %v2793_v47, %v4170_v59  ;;  %v2214_v0 = vpop.f32.mrb[9].mxu0 }
 0x284   : > { %v2215_v27 = vadd.f32 %v4170_v59, %v2214_v0 }
 0x285   : > { %2342 = vst.msk [vmem:[%s4182_s27 + $0x48] sm:$0xff] %vm1764_vm3, %v2220_v25  ;;  %v1311_v31 = vpop.permute.xlu1 %1310  ;;  %v2445_v11 = vmul.f32 %v2220_v25, %v2220_v25  ;;  %v2382_v17 = vsel %vm1764_vm3, %v2220_v25, 0.0  ;;  %v4677_v25 = vld [vmem:[#allocation49_spill] sm:$0xff] }
 0x286   : > { %2341 = vst.msk [vmem:[%s4182_s27 + $0x40] sm:$0xff] %vm1764_vm3, %v2215_v27  ;;  %v2380_v21 = vsel %vm1764_vm3, %v2215_v27, 0.0  ;;  %v2444_v60 = vmul.f32 %v2215_v27, %v2215_v27  ;;  %v1439_v61 = vpop.permute.xlu0 %1438  ;;  %v1893_v8 = vsel %vm1863_vm6, %v1860_v63, %v1311_v31 }
 0x287   : > { %v2381_v38 = vadd.f32 %v2380_v21, %v2379_v55  ;;  %v2485_v56 = vsel %vm1764_vm3, %v2445_v11, 0.0  ;;  %v1892_v55 = vsel %vm1863_vm6, %v1859_v3, %v1309_v52  ;;  %v1926_v18 = vsel %vm1896_vm8, %v1893_v8, %v1439_v61  ;;  %v450_v61 = vld [vmem:[#allocation2 + $0x170] sm:$0xff] }
 0x288   : > { %v2483_v51 = vsel %vm1764_vm3, %v2444_v60, 0.0  ;;  %v1925_v37 = vsel %vm1896_vm8, %v1892_v55, %v1437_v9  ;;  %v1795_v9 = vsel %vm1764_vm3, %v1762_v62, %v4677_v25 }
 0x289   : > { %v2484_v7 = vadd.f32 %v2483_v51, %v2482_v29  ;;  %v1057_v34 = vpop.permute.xlu1 %1056  ;;  %v2383_v6 = vadd.f32 %v2382_v17, %v2381_v38 }
 0x28a   : > { %v1059_v44 = vpop.permute.xlu0 %1058  ;;  %v1828_v27 = vsel %vm1797_vm4, %v1795_v9, %v1057_v34 }
 0x28b   : > { %v2486_v40 = vadd.f32 %v2485_v56, %v2484_v7  ;;  %v4678_v7 = vld [vmem:[#allocation31_spill] sm:$0xff] }
 0x28d   : > { %v1565_v30 = vpop.permute.xlu1 %1564 }
 0x28e   : > { %v1567_v50 = vpop.permute.xlu0 %1566  ;;  %v1958_v28 = vsel %vm1929_vm7, %v1925_v37, %v1565_v30 }
 0x28f   : > { %v1959_v24 = vsel %vm1929_vm7, %v1926_v18, %v1567_v50 }
 0x291   : > { %v1185_v2 = vpop.permute.xlu1 %1184 }
 0x292   : > { %v1187_v20 = vpop.permute.xlu0 %1186  ;;  %v1861_v21 = vsel %vm1830_vm5, %v1828_v27, %v1185_v2 }
 0x293   : > { %v2796_v33 = vpop.f32.mrb[10].mxu0 }
 0x294   : > { %v2230_v57 = vadd.f32 %v2796_v33, %v4170_v59  ;;  %v2224_v35 = vpop.f32.mrb[11].mxu0 }
 0x295   : > { %v1693_v29 = vpop.permute.xlu1 %1692  ;;  %v2225_v42 = vadd.f32 %v4170_v59, %v2224_v35 }
 0x296   : > { %v1991_v4 = vsel %vm1962_vm9, %v1958_v28, %v1693_v29  ;;  %2344 = vst.msk [vmem:[%s4182_s27 + $0x58] sm:$0xff] %vm1764_vm3, %v2230_v57  ;;  %v1695_v45 = vpop.permute.xlu0 %1694  ;;  %v2447_v32 = vmul.f32 %v2230_v57, %v2230_v57  ;;  %v2386_v16 = vsel %vm1764_vm3, %v2230_v57, 0.0 }
 0x297   : > { %2821 = vmatprep.mubr.msk.f32.mxu1 %vm2007_vm10, %v1991_v4  ;;  %2343 = vst.msk [vmem:[%s4182_s27 + $0x50] sm:$0xff] %vm1764_vm3, %v2225_v42  ;;  %v2384_v43 = vsel %vm1764_vm3, %v2225_v42, 0.0  ;;  %v2446_v14 = vmul.f32 %v2225_v42, %v2225_v42  ;;  %v1992_v46 = vsel %vm1962_vm9, %v1959_v24, %v1695_v45 }
 0x298   : > { %v2385_v5 = vadd.f32 %v2384_v43, %v2383_v6  ;;  %2822 = vmatmul.mubr.msk.f32.gmra.mrb[12].mxu1 %vm2007_vm10, %v1992_v46  ;;  %v2489_v0 = vsel %vm1764_vm3, %v2447_v32, 0.0  ;;  %v1763_v6 = vsel %vm330_vm0, %v450_v61, %v4678_v7 }
 0x299   : > { %v1313_v12 = vpop.permute.xlu1 %1312  ;;  %v2487_v53 = vsel %vm1764_vm3, %v2446_v14, 0.0 }
 0x29a   : > { %v2488_v48 = vadd.f32 %v2487_v53, %v2486_v40  ;;  %v1441_v52 = vpop.permute.xlu0 %1440  ;;  %v2387_v47 = vadd.f32 %v2386_v16, %v2385_v5  ;;  %v1894_v60 = vsel %vm1863_vm6, %v1861_v21, %v1313_v12  ;;  %v4679_v40 = vld [vmem:[#allocation51_spill] sm:$0xff] }
 0x29b   : > { %v1927_v51 = vsel %vm1896_vm8, %v1894_v60, %v1441_v52  ;;  %v1796_v34 = vsel %vm1764_vm3, %v1763_v6, %v4679_v40 }
 0x29c   : > { %v2490_v11 = vadd.f32 %v2489_v0, %v2488_v48  ;;  %v1829_v49 = vsel %vm1797_vm4, %v1796_v34, %v1059_v44 }
 0x29d   : > { %v1315_v31 = vpop.permute.xlu1 %1314  ;;  %v1862_v30 = vsel %vm1830_vm5, %v1829_v49, %v1187_v20 }
 0x29e   : > { %v1569_v38 = vpop.permute.xlu0 %1568  ;;  %v1895_v10 = vsel %vm1863_vm6, %v1862_v30, %v1315_v31 }
 0x29f   : > { %v1960_v22 = vsel %vm1929_vm7, %v1927_v51, %v1569_v38 }
 0x2a1   : > { %v1443_v17 = vpop.permute.xlu1 %1442 }
 0x2a2   : > { %v1697_v56 = vpop.permute.xlu0 %1696  ;;  %v1928_v26 = vsel %vm1896_vm8, %v1895_v10, %v1443_v17 }
 0x2a3   : > { %v1993_v23 = vsel %vm1962_vm9, %v1960_v22, %v1697_v56 }
 0x2a4   : > { %2824 = vmatprep.mubr.msk.f32.mxu1 %vm2007_vm10, %v1993_v23 }
 0x2a5   : > { %v1571_v58 = vpop.permute.xlu1 %1570 }
 0x2a6   : > { %v1961_v13 = vsel %vm1929_vm7, %v1928_v26, %v1571_v58 }
 0x2a9   : > { %v1699_v15 = vpop.permute.xlu1 %1698 }
 0x2aa   : > { %v1994_v36 = vsel %vm1962_vm9, %v1961_v13, %v1699_v15 }
 0x2ab   : > { %2825 = vmatmul.mubr.msk.f32.gmra.mrb[14].mxu1 %vm2007_vm10, %v1994_v36  ;;  %v2799_v50 = vpop.f32.mrb[12].mxu0 }
 0x2ac   : > { %v2240_v44 = vadd.f32 %v2799_v50, %v4170_v59  ;;  %v2234_v39 = vpop.f32.mrb[13].mxu0 }
 0x2ad   : > { %v2235_v54 = vadd.f32 %v4170_v59, %v2234_v39 }
 0x2ae   : > { %2346 = vst.msk [vmem:[%s4182_s27 + $0x68] sm:$0xff] %vm1764_vm3, %v2240_v44  ;;  %v2449_v3 = vmul.f32 %v2240_v44, %v2240_v44  ;;  %v2390_v63 = vsel %vm1764_vm3, %v2240_v44, 0.0 }
 0x2af   : > { %2345 = vst.msk [vmem:[%s4182_s27 + $0x60] sm:$0xff] %vm1764_vm3, %v2235_v54  ;;  %v2388_v41 = vsel %vm1764_vm3, %v2235_v54, 0.0  ;;  %v2448_v55 = vmul.f32 %v2235_v54, %v2235_v54 }
 0x2b0   : > { %v2389_v2 = vadd.f32 %v2388_v41, %v2387_v47  ;;  %v2493_v33 = vsel %vm1764_vm3, %v2449_v3, 0.0 }
 0x2b1   : > { %v2491_v8 = vsel %vm1764_vm3, %v2448_v55, 0.0 }
 0x2b2   : > { %v2492_v20 = vadd.f32 %v2491_v8, %v2490_v11  ;;  %v2391_v37 = vadd.f32 %v2390_v63, %v2389_v2 }
 0x2b4   : > { %v2494_v28 = vadd.f32 %v2493_v33, %v2492_v20 }
 0x2c3   : > { %v2802_v57 = vpop.f32.mrb[14].mxu0 }
 0x2c4   : > { %v2250_v29 = vadd.f32 %v2802_v57, %v4170_v59  ;;  %v2244_v35 = vpop.f32.mrb[15].mxu0 }
 0x2c5   : > { %v2245_v18 = vadd.f32 %v4170_v59, %v2244_v35 }
 0x2c6   : > { %2348 = vst.msk [vmem:[%s4182_s27 + $0x78] sm:$0xff] %vm1764_vm3, %v2250_v29  ;;  %v2451_v4 = vmul.f32 %v2250_v29, %v2250_v29  ;;  %v2394_v19 = vsel %vm1764_vm3, %v2250_v29, 0.0 }
 0x2c7   : > { %2347 = vst.msk [vmem:[%s4182_s27 + $0x70] sm:$0xff] %vm1764_vm3, %v2245_v18  ;;  %v2392_v42 = vsel %vm1764_vm3, %v2245_v18, 0.0  ;;  %v2450_v24 = vmul.f32 %v2245_v18, %v2245_v18 }
 0x2c8   : > { %v2393_v45 = vadd.f32 %v2392_v42, %v2391_v37  ;;  %v2497_v46 = vsel %vm1764_vm3, %v2451_v4, 0.0 }
 0x2c9   : > { %v2495_v32 = vsel %vm1764_vm3, %v2450_v24, 0.0 }
 0x2ca   : > { %v2496_v43 = vadd.f32 %v2495_v32, %v2494_v28  ;;  %v2395_v14 = vadd.f32 %v2394_v19, %v2393_v45 }
 0x2cc   : > { %v2498_v5 = vadd.f32 %v2497_v46, %v2496_v43 }
 0x2db   : > { %v2805_v12 = vpop.f32.mrb[0].mxu1 }
 0x2dc   : > { %v2260_v16 = vadd.f32 %v2805_v12, %v4170_v59  ;;  %v2254_v53 = vpop.f32.mrb[1].mxu1 }
 0x2dd   : > { %v2255_v1 = vadd.f32 %v4170_v59, %v2254_v53 }
 0x2de   : > { %2350 = vst.msk [vmem:[%s4182_s27 + $0x88] sm:$0xff] %vm1764_vm3, %v2260_v16  ;;  %v2453_v62 = vmul.f32 %v2260_v16, %v2260_v16  ;;  %v2398_v25 = vsel %vm1764_vm3, %v2260_v16, 0.0 }
 0x2df   : > { %2349 = vst.msk [vmem:[%s4182_s27 + $0x80] sm:$0xff] %vm1764_vm3, %v2255_v1  ;;  %v2396_v48 = vsel %vm1764_vm3, %v2255_v1, 0.0  ;;  %v2452_v52 = vmul.f32 %v2255_v1, %v2255_v1 }
 0x2e0   : > { %v2397_v47 = vadd.f32 %v2396_v48, %v2395_v14  ;;  %v2501_v31 = vsel %vm1764_vm3, %v2453_v62, 0.0 }
 0x2e1   : > { %v2499_v9 = vsel %vm1764_vm3, %v2452_v52, 0.0 }
 0x2e2   : > { %v2500_v0 = vadd.f32 %v2499_v9, %v2498_v5  ;;  %v2399_v27 = vadd.f32 %v2398_v25, %v2397_v47 }
 0x2e4   : > { %v2502_v11 = vadd.f32 %v2501_v31, %v2500_v0 }
 0x2f3   : > { %v2808_v21 = vpop.f32.mrb[2].mxu1 }
 0x2f4   : > { %v2270_v60 = vadd.f32 %v2808_v21, %v4170_v59  ;;  %v2264_v38 = vpop.f32.mrb[3].mxu1 }
 0x2f5   : > { %v2265_v61 = vadd.f32 %v4170_v59, %v2264_v38 }
 0x2f6   : > { %2352 = vst.msk [vmem:[%s4182_s27 + $0x98] sm:$0xff] %vm1764_vm3, %v2270_v60  ;;  %v2455_v17 = vmul.f32 %v2270_v60, %v2270_v60  ;;  %v2402_v22 = vsel %vm1764_vm3, %v2270_v60, 0.0 }
 0x2f7   : > { %2351 = vst.msk [vmem:[%s4182_s27 + $0x90] sm:$0xff] %vm1764_vm3, %v2265_v61  ;;  %v2400_v51 = vsel %vm1764_vm3, %v2265_v61, 0.0  ;;  %v2454_v7 = vmul.f32 %v2265_v61, %v2265_v61 }
 0x2f8   : > { %v2401_v6 = vadd.f32 %v2400_v51, %v2399_v27  ;;  %v2505_v23 = vsel %vm1764_vm3, %v2455_v17, 0.0 }
 0x2f9   : > { %v2503_v56 = vsel %vm1764_vm3, %v2454_v7, 0.0 }
 0x2fa   : > { %v2504_v40 = vadd.f32 %v2503_v56, %v2502_v11  ;;  %v2403_v34 = vadd.f32 %v2402_v22, %v2401_v6 }
 0x2fc   : > { %v2506_v49 = vadd.f32 %v2505_v23, %v2504_v40 }
 0x30b   : > { %v2811_v58 = vpop.f32.mrb[4].mxu1 }
 0x30c   : > { %v2280_v30 = vadd.f32 %v2811_v58, %v4170_v59  ;;  %v2274_v10 = vpop.f32.mrb[5].mxu1 }
 0x30d   : > { %v2275_v26 = vadd.f32 %v4170_v59, %v2274_v10 }
 0x30e   : > { %2354 = vst.msk [vmem:[%s4182_s27 + $0xa8] sm:$0xff] %vm1764_vm3, %v2280_v30  ;;  %v2457_v13 = vmul.f32 %v2280_v30, %v2280_v30  ;;  %v2406_v44 = vsel %vm1764_vm3, %v2280_v30, 0.0 }
 0x30f   : > { %2353 = vst.msk [vmem:[%s4182_s27 + $0xa0] sm:$0xff] %vm1764_vm3, %v2275_v26  ;;  %v2404_v15 = vsel %vm1764_vm3, %v2275_v26, 0.0  ;;  %v2456_v36 = vmul.f32 %v2275_v26, %v2275_v26 }
 0x310   : > { %v2405_v50 = vadd.f32 %v2404_v15, %v2403_v34  ;;  %v2509_v41 = vsel %vm1764_vm3, %v2457_v13, 0.0 }
 0x311   : > { %v2507_v39 = vsel %vm1764_vm3, %v2456_v36, 0.0 }
 0x312   : > { %v2508_v54 = vadd.f32 %v2507_v39, %v2506_v49  ;;  %v2407_v3 = vadd.f32 %v2406_v44, %v2405_v50 }
 0x314   : > { %v2510_v55 = vadd.f32 %v2509_v41, %v2508_v54 }
 0x323   : > { %v2814_v2 = vpop.f32.mrb[6].mxu1 }
 0x324   : > { %v2290_v63 = vadd.f32 %v2814_v2, %v4170_v59  ;;  %v2284_v8 = vpop.f32.mrb[7].mxu1 }
 0x325   : > { %v2285_v20 = vadd.f32 %v4170_v59, %v2284_v8 }
 0x326   : > { %2356 = vst.msk [vmem:[%s4182_s27 + $0xb8] sm:$0xff] %vm1764_vm3, %v2290_v63  ;;  %v2459_v37 = vmul.f32 %v2290_v63, %v2290_v63  ;;  %v2410_v29 = vsel %vm1764_vm3, %v2290_v63, 0.0 }
 0x327   : > { %2355 = vst.msk [vmem:[%s4182_s27 + $0xb0] sm:$0xff] %vm1764_vm3, %v2285_v20  ;;  %v2408_v33 = vsel %vm1764_vm3, %v2285_v20, 0.0  ;;  %v2458_v28 = vmul.f32 %v2285_v20, %v2285_v20 }
 0x328   : > { %v2409_v57 = vadd.f32 %v2408_v33, %v2407_v3  ;;  %v2513_v42 = vsel %vm1764_vm3, %v2459_v37, 0.0 }
 0x329   : > { %v2511_v35 = vsel %vm1764_vm3, %v2458_v28, 0.0 }
 0x32a   : > { %v2512_v18 = vadd.f32 %v2511_v35, %v2510_v55  ;;  %v2411_v4 = vadd.f32 %v2410_v29, %v2409_v57 }
 0x32c   : > { %v2514_v24 = vadd.f32 %v2513_v42, %v2512_v18 }
 0x33b   : > { %v2817_v45 = vpop.f32.mrb[8].mxu1 }
 0x33c   : > { %v2300_v19 = vadd.f32 %v2817_v45, %v4170_v59  ;;  %v2294_v32 = vpop.f32.mrb[9].mxu1 }
 0x33d   : > { %v2295_v43 = vadd.f32 %v4170_v59, %v2294_v32 }
 0x33e   : > { %2358 = vst.msk [vmem:[%s4182_s27 + $0xc8] sm:$0xff] %vm1764_vm3, %v2300_v19  ;;  %v2461_v14 = vmul.f32 %v2300_v19, %v2300_v19  ;;  %v2414_v16 = vsel %vm1764_vm3, %v2300_v19, 0.0 }
 0x33f   : > { %2357 = vst.msk [vmem:[%s4182_s27 + $0xc0] sm:$0xff] %vm1764_vm3, %v2295_v43  ;;  %v2412_v46 = vsel %vm1764_vm3, %v2295_v43, 0.0  ;;  %v2460_v5 = vmul.f32 %v2295_v43, %v2295_v43 }
 0x340   : > { %v2413_v12 = vadd.f32 %v2412_v46, %v2411_v4  ;;  %v2517_v48 = vsel %vm1764_vm3, %v2461_v14, 0.0 }
 0x341   : > { %v2515_v53 = vsel %vm1764_vm3, %v2460_v5, 0.0 }
 0x342   : > { %v2516_v1 = vadd.f32 %v2515_v53, %v2514_v24  ;;  %v2415_v62 = vadd.f32 %v2414_v16, %v2413_v12 }
 0x344   : > { %v2518_v52 = vadd.f32 %v2517_v48, %v2516_v1 }
 0x353   : > { %v2820_v47 = vpop.f32.mrb[10].mxu1 }
 0x354   : > { %v2310_v25 = vadd.f32 %v2820_v47, %v4170_v59  ;;  %v2304_v9 = vpop.f32.mrb[11].mxu1 }
 0x355   : > { %v2305_v0 = vadd.f32 %v4170_v59, %v2304_v9 }
 0x356   : > { %2360 = vst.msk [vmem:[%s4182_s27 + $0xd8] sm:$0xff] %vm1764_vm3, %v2310_v25  ;;  %v2463_v27 = vmul.f32 %v2310_v25, %v2310_v25  ;;  %v2418_v60 = vsel %vm1764_vm3, %v2310_v25, 0.0 }
 0x357   : > { %2359 = vst.msk [vmem:[%s4182_s27 + $0xd0] sm:$0xff] %vm1764_vm3, %v2305_v0  ;;  %v2416_v31 = vsel %vm1764_vm3, %v2305_v0, 0.0  ;;  %v2462_v11 = vmul.f32 %v2305_v0, %v2305_v0 }
 0x358   : > { %v2417_v21 = vadd.f32 %v2416_v31, %v2415_v62  ;;  %v2521_v51 = vsel %vm1764_vm3, %v2463_v27, 0.0 }
 0x359   : > { %v2519_v38 = vsel %vm1764_vm3, %v2462_v11, 0.0 }
 0x35a   : > { %v2520_v61 = vadd.f32 %v2519_v38, %v2518_v52  ;;  %v2419_v17 = vadd.f32 %v2418_v60, %v2417_v21 }
 0x35c   : > { %v2522_v7 = vadd.f32 %v2521_v51, %v2520_v61 }
 0x36b   : > { %v2823_v6 = vpop.f32.mrb[12].mxu1 }
 0x36c   : > { %v2320_v22 = vadd.f32 %v2823_v6, %v4170_v59  ;;  %v2314_v56 = vpop.f32.mrb[13].mxu1 }
 0x36d   : > { %v2315_v40 = vadd.f32 %v4170_v59, %v2314_v56 }
 0x36e   : > { %2362 = vst.msk [vmem:[%s4182_s27 + $0xe8] sm:$0xff] %vm1764_vm3, %v2320_v22  ;;  %v2465_v34 = vmul.f32 %v2320_v22, %v2320_v22  ;;  %v2422_v30 = vsel %vm1764_vm3, %v2320_v22, 0.0 }
 0x36f   : > { %2361 = vst.msk [vmem:[%s4182_s27 + $0xe0] sm:$0xff] %vm1764_vm3, %v2315_v40  ;;  %v2420_v23 = vsel %vm1764_vm3, %v2315_v40, 0.0  ;;  %v2464_v49 = vmul.f32 %v2315_v40, %v2315_v40 }
 0x370   : > { %v2421_v58 = vadd.f32 %v2420_v23, %v2419_v17  ;;  %v2525_v15 = vsel %vm1764_vm3, %v2465_v34, 0.0 }
 0x371   : > { %v2523_v10 = vsel %vm1764_vm3, %v2464_v49, 0.0 }
 0x372   : > { %v2524_v26 = vadd.f32 %v2523_v10, %v2522_v7  ;;  %v2423_v13 = vadd.f32 %v2422_v30, %v2421_v58 }
 0x374   : > { %v2526_v36 = vadd.f32 %v2525_v15, %v2524_v26 }
 0x37e   : > { %v2826_v50 = vpop.f32.mrb[14].mxu1 }
 0x37f   : > { %v2330_v44 = vadd.f32 %v2826_v50, %v4170_v59  ;;  %v2324_v39 = vpop.f32.mrb[15].mxu1 }
 0x380   : > { %v2325_v54 = vadd.f32 %v4170_v59, %v2324_v39 }
 0x381   : > { %2364 = vst.msk [vmem:[%s4182_s27 + $0xf8] sm:$0xff] %vm1764_vm3, %v2330_v44  ;;  %v2467_v3 = vmul.f32 %v2330_v44, %v2330_v44  ;;  %v2426_v63 = vsel %vm1764_vm3, %v2330_v44, 0.0 }
 0x382   : > { %2363 = vst.msk [vmem:[%s4182_s27 + $0xf0] sm:$0xff] %vm1764_vm3, %v2325_v54  ;;  %v2424_v41 = vsel %vm1764_vm3, %v2325_v54, 0.0  ;;  %v2466_v55 = vmul.f32 %v2325_v54, %v2325_v54  ;;  %s2900_s27 = scalar_lea.vmem %s2899_s23, 32 }
 0x383   : > { %v2425_v2 = vadd.f32 %v2424_v41, %v2423_v13  ;;  %v2529_v33 = vsel %vm1764_vm3, %v2467_v3, 0.0  ;;  %p2902_p1 = scmp.lt.s32.totalorder %s2900_s27, %s2894_s18 }
 0x384   : > { %v2527_v8 = vsel %vm1764_vm3, %v2466_v55, 0.0 }
 0x385   : > { %v2427_v20 = vadd.f32 %v2426_v63, %v2425_v2  ;;  %v2528_v37 = vadd.f32 %v2527_v8, %v2526_v36  ;;  %p2903_p2 = por %p2902_p1, %p2901_p0 }
 0x387   : > { %v2428_v28 = vrot.slane %v2427_v20, 4  ;;  %v2530_v59 = vadd.f32 %v2529_v33, %v2528_v37  ;;  %p2904_p3 = pnand %p2903_p2, %p2897_p13 }
 0x389   : > { %v2429_v57 = vadd.f32 %v2428_v28, %v2427_v20  ;;  %v2531_v29 = vrot.slane %v2530_v59, 4 }
 0x38b   : > { %v2430_v35 = vrot.slane %v2429_v57, 2  ;;  %v2532_v18 = vadd.f32 %v2531_v29, %v2530_v59 }
 0x38d   : > { %v2431_v4 = vadd.f32 %v2430_v35, %v2429_v57  ;;  %v2533_v42 = vrot.slane %v2532_v18, 2 }
 0x38f   : > { %v2432_v24 = vrot.slane %v2431_v4, 1  ;;  %v2534_v45 = vadd.f32 %v2533_v42, %v2532_v18 }
 0x391   : > { %v2433_v19 = vadd.f32 %v2432_v24, %v2431_v4  ;;  %v2535_v32 = vrot.slane %v2534_v45, 1 }
 0x393   : > { %2435 = vst.msk [vmem:[%s281_s29] sm:$0x1] %vm2434_vm11, %v2433_v19  ;;  %v2536_v43 = vadd.f32 %v2535_v32, %v2534_v45 }
 0x394   : > { %2907 = shalt.err (!%p2904_p3)
}
 0x395   : > { %s2908_s12 = scalar_lea.hbm %s4498_s20, 16  ;;  %s2912_s17 = scalar_lea.hbm %s4580_s6, 32 }
 0x396   : > { %p2909_p4 = scmp.ne.s32.totalorder %s4498_s20, %s2908_s12  ;;  %p2913_p9 = scmp.lt.u32.totalorder %s4498_s20, %s4580_s6 }
 0x397   : > { %p2914_p10 = scmp.lt.u32.totalorder %s2912_s17, %s2908_s12  ;;  %p2916_p12 = scmp.lt.u32.totalorder %s2908_s12, %s4498_s20 }
 0x398   : > { %p2910_p7 = pnand %p2909_p4, %p3079_p5 }
 0x399   : > { %p2915_p11 = por %p2914_p10, %p2913_p9 }
 0x39a   : > { %p2911_p8 = pneg %p2910_p7 }
 0x39b   : > { %p2917_p13 = por %p2916_p12, %p2915_p11 }
 0x39d   : > { %p2918_p0 = pnand %p2917_p13, %p2911_p8 }
 0x39f   : > { %2921 = shalt.err (!%p2918_p0)
}
 0x3a0   : > { %2841 = dma.vmem_to_hbm [thread:$0]  (%p3079_p5), %s4500_s30, 16, %s4498_s20, %s2544_s15   ;;  %2537 = vst.msk [vmem:[%s287_s13] sm:$0x1] %vm2434_vm11, %v2536_v43 }
 0x3a1   : > { %s2548_s18 = scalar_lea.sflag [#allocation6], %s4488_s11  ;;  %s2922_s19 = scalar_lea.vmem %s4508_s14, 16 }
 0x3a2   : > { %p2923_p1 = scmp.ne.s32.totalorder %s4508_s14, %s2922_s19  ;;  %s3000_s23 = smov [#allocation5]  }
 0x3a3   : > { %s2926_s27 = sshll.u32 %s3000_s23, 4  ;;  %s2927_s27 = int_to_ptr.vmem [resolvable:$false] %s2926_s27 }
 0x3a4   : > { %p2924_p2 = pnand %p2923_p1, %p3079_p5  ;;  %s2928_s12 = scalar_lea.vmem %s2927_s27, 32 }
 0x3a5   : > { %p2929_p4 = scmp.lt.s32.totalorder %s4508_s14, %s2927_s27  ;;  %p2930_p7 = scmp.lt.s32.totalorder %s2928_s12, %s2922_s19 }
 0x3a6   : > { %p2925_p3 = pneg %p2924_p2 }
 0x3a7   : > { %p2931_p8 = por %p2930_p7, %p2929_p4 }
 0x3a9   : > { %p2932_p9 = pnand %p2931_p8, %p2925_p3 }
 0x3ab   : > { %2935 = shalt.err (!%p2932_p9)
}
 0x3ac   : > { %s2936_s11 = scalar_lea.hbm %s4506_s22, 16  ;;  %s2940_s20 = scalar_lea.hbm %s4581_s7, 32 }
 0x3ad   : > { %p2937_p10 = scmp.ne.s32.totalorder %s4506_s22, %s2936_s11  ;;  %p2941_p13 = scmp.lt.u32.totalorder %s4506_s22, %s4581_s7 }
 0x3ae   : > { %p2942_p0 = scmp.lt.u32.totalorder %s2940_s20, %s2936_s11  ;;  %p2944_p2 = scmp.lt.u32.totalorder %s2936_s11, %s4506_s22 }
 0x3af   : > { %p2938_p11 = pnand %p2937_p10, %p3079_p5 }
 0x3b0   : > { %p2943_p1 = por %p2942_p0, %p2941_p13 }
 0x3b1   : > { %p2939_p12 = pneg %p2938_p11 }
 0x3b2   : > { %p2945_p3 = por %p2944_p2, %p2943_p1 }
 0x3b4   : > { %p2946_p4 = pnand %p2945_p3, %p2939_p12 }
 0x3b6   : > { %2949 = shalt.err (!%p2946_p4)
}
 0x3b7   : > { %2842 = dma.vmem_to_hbm [thread:$0]  (%p3079_p5), %s4508_s14, 16, %s4506_s22, %s2548_s18  }
 0x3b8 PF: > { %p2852_p7 = scmp.ge.s32.totalorder %s2988_s4, 2  ;;  %s2596_s16 = sand.u32 1, %s2976_s24  }
 0x3b9   : > { %s2597_s17 = scalar_lea.sflag [#allocation4], %s2596_s16 }
 0x3ba   : > { %p2846_p8 = pnand %p2852_p7, %p3083_p6 }
 0x3bc   : > { %2967 = dma.done.wait (!%p2846_p8), %s2597_s17, 16  }
 0x3bd   : > { %2969 = vsyncadd (!%p2846_p8), %s2597_s17, 4294967280  ;;  %s2605_s26 = scalar_lea.sflag [#allocation6], %s2596_s16 }
 0x3be   : > { %2971 = dma.done.wait (!%p2846_p8), %s2605_s26, 16  }
 0x3bf   : > { %2973 = vsyncadd (!%p2846_p8), %s2605_s26, 4294967280  ;;  %p21_p5 = scmp.ge.s32.totalorder %s3066_s28, 4   ;;  %s4680_s24 = smov %s2980_s25 }
 0x3c0   : > { %s4681_s25 = smov %s2984_s3  ;;  %s4682_s3 = smov %s3077_s8 }
 0x3c1   : > { %s4683_s4 = smov %s3066_s28  ;;  %23 = sbr.rel (!%p21_p5) target bundleno = 5 (0x5), region = 106 }
 0x3c8   :  { %2609 = vsyncpa [#allocation4], 1 }
 0x3c9   :  { %2611 = vsyncpa [#allocation4 + $0x1], 1 }
 0x3ca   :  { %2612 = vsyncpa [#allocation6], 1 }
 0x3cb   :  { %2614 = vsyncpa [#allocation6 + $0x1], 1 }

</bundles_post_ra>
